<compile_context>
chip_gen: v5e
topology: v5e:2x2
jax: 0.10.0
libtpu: 0.0.40
codegen_flags: <defaults>
</compile_context>

<pallas_src>
import math

import jax
import jax.numpy as jnp
from jax.experimental import pallas as pl
from jax.experimental.pallas import tpu as pltpu


def adaptmlp_kernel(x_ref, wd_ref, bd_ref, wu_ref, bu_ref,
                    w1_ref, b1_ref, w2_ref, b2_ref, o_ref):
    x = x_ref[...]                                                      # (tm, D) bf16

    # ---- frozen original MLP: Linear -> GELU -> Linear (single pass) ----
    h = jnp.dot(x, w1_ref[...], preferred_element_type=jnp.float32)    # (tm, H) f32
    h = jax.nn.gelu(h + b1_ref[...], approximate=True)                 # f32 bias+GELU
    orig = jnp.dot(h.astype(w2_ref.dtype), w2_ref[...],
                   preferred_element_type=jnp.float32)                 # (tm, D) f32

    # ---- adapter bottleneck path (scale pre-folded into wu/bu) ----
    down = jnp.dot(x, wd_ref[...], preferred_element_type=jnp.float32) # (tm, MIDp)
    down = jnp.maximum(down + bd_ref[...], 0.0)                        # ReLU, f32
    # dropout(p=0.0) is identity at inference time
    up = jnp.dot(down.astype(wu_ref.dtype), wu_ref[...],
                 preferred_element_type=jnp.float32)                   # (tm, D) f32

    o_ref[...] = (orig + b2_ref[...] + up + bu_ref[...]).astype(o_ref.dtype)


def _pad_axis(a, axis, new_size):
    pad = new_size - a.shape[axis]
    if pad == 0:
        return a
    widths = [(0, 0)] * a.ndim
    widths[axis] = (0, pad)
    return jnp.pad(a, widths)


def adapt_mlp(x, params, *, scale=0.1, tm=512):
    """x: (B, S, D) float32.  params: dict of f32 weights laid out (in, out)."""
    B, S, D = x.shape
    M = B * S
    H = params["w1"].shape[1]
    MID = params["wd"].shape[1]
    MIDp = max(128, pl.cdiv(MID, 128) * 128)          # lane-dense bottleneck

    # Token tiling: pad M up to a multiple of the tile (handles 197-token ViT
    # sequences, odd batches, ...).  Padded rows are zero and sliced off below.
    tm_eff = tm if M > tm else pl.cdiv(M, 8) * 8
    Mp = pl.cdiv(M, tm_eff) * tm_eff

    bf16 = jnp.bfloat16
    x2 = x.reshape(M, D)
    if Mp != M:
        x2 = jnp.pad(x2, ((0, Mp - M), (0, 0)))
    x2 = x2.astype(bf16)

    # Weight matrices go to the MXU in bf16; biases stay f32 (elementwise path).
    # Zero-padding wd columns / bd / wu rows keeps the adapter math exact.
    wd = _pad_axis(params["wd"], 1, MIDp).astype(bf16)
    bd = _pad_axis(params["bd"], 1, MIDp).astype(jnp.float32)
    wu = _pad_axis(params["wu"] * scale, 0, MIDp).astype(bf16)   # fold frozen scale
    bu = (params["bu"] * scale).astype(jnp.float32)
    w1 = params["w1"].astype(bf16)
    b1 = params["b1"].astype(jnp.float32)
    w2 = params["w2"].astype(bf16)
    b2 = params["b2"].astype(jnp.float32)

    # All weights fully resident (constant-index full blocks).  For ViT-B/L the
    # bf16 W1+W2 footprint is ~9-16 MiB, well inside VMEM on every generation.
    full = lambda a: pl.BlockSpec(a.shape, lambda i: (0,) * a.ndim)

    cost = pl.CostEstimate(
        flops=4 * Mp * D * H + 4 * Mp * D * MIDp,
        transcendentals=Mp * H,
        bytes_accessed=(x2.size * 2                      # activations in (bf16)
                        + Mp * D * x.dtype.itemsize      # output writeback
                        + 2 * (wd.size + wu.size + w1.size + w2.size)  # weights, once
                        + 4 * (bd.size + bu.size + b1.size + b2.size)),
    )

    out = pl.pallas_call(
        adaptmlp_kernel,
        out_shape=jax.ShapeDtypeStruct((Mp, D), x.dtype),
        grid=(Mp // tm_eff,),
        in_specs=[
            pl.BlockSpec((tm_eff, D), lambda i: (i, 0)),   # token tile
            full(wd), full(bd), full(wu), full(bu),        # adapter (resident)
            full(w1), full(b1), full(w2), full(b2),        # frozen MLP (resident)
        ],
        out_specs=pl.BlockSpec((tm_eff, D), lambda i: (i, 0)),
        compiler_params=pltpu.CompilerParams(
            dimension_semantics=("parallel",),
            vmem_limit_bytes=48 * 1024 * 1024),            # < v7x 64 MiB physical
        cost_estimate=cost,
    )(x2, wd, bd, wu, bu, w1, b1, w2, b2)

    if Mp != M:
        out = out[:M]
    return out.reshape(B, S, D)


def init_params(key, in_dim, mid_dim, hidden_dim, dtype=jnp.float32):
    """Deterministic init mirroring the PyTorch module."""
    k1, k2, k3, k4, k5 = jax.random.split(key, 5)

    # down_proj: kaiming_uniform_ (fan_in = in_dim), zero bias
    bound_d = math.sqrt(6.0 / in_dim)
    wd = jax.random.uniform(k1, (in_dim, mid_dim), dtype, -bound_d, bound_d)
    bd = jnp.zeros((1, mid_dim), dtype)

    # up_proj: zero weight, zero bias (AdaptFormer zero-init)
    wu = jnp.zeros((mid_dim, in_dim), dtype)
    bu = jnp.zeros((1, in_dim), dtype)

    # frozen original MLP (default nn.Linear init: U(-1/sqrt(fan_in), +))
    b1_bound = 1.0 / math.sqrt(in_dim)
    w1 = jax.random.uniform(k2, (in_dim, hidden_dim), dtype, -b1_bound, b1_bound)
    b1 = jax.random.uniform(k3, (1, hidden_dim), dtype, -b1_bound, b1_bound)
    b2_bound = 1.0 / math.sqrt(hidden_dim)
    w2 = jax.random.uniform(k4, (hidden_dim, in_dim), dtype, -b2_bound, b2_bound)
    b2 = jax.random.uniform(k5, (1, in_dim), dtype, -b2_bound, b2_bound)

    return dict(wd=wd, bd=bd, wu=wu, bu=bu, w1=w1, b1=b1, w2=w2, b2=b2)


def reference(x, p, scale=0.1):
    """Pure-JAX reference, mirroring the kernel's bf16 MXU inputs + f32 accumulation."""
    bf = lambda a: a.astype(jnp.bfloat16).astype(jnp.float32)
    B, S, D = x.shape
    x2 = bf(x.reshape(B * S, D))
    h = jax.nn.gelu(x2 @ bf(p["w1"]) + p["b1"], approximate=True)
    orig = bf(h) @ bf(p["w2"]) + p["b2"]
    down = jnp.maximum(x2 @ bf(p["wd"]) + p["bd"], 0.0)
    up = bf(down) @ bf(p["wu"] * scale) + p["bu"] * scale
    return (orig + up).reshape(B, S, D)


if __name__ == "__main__":
    # Small, lane-dense D; an odd token count (M = 200) exercises the padded
    # multi-tile path (tm=128 -> grid of 2, last tile partially padded).
    B, S, D = 2, 100, 128       # batch, seq, in_dim  -> M = 200 tokens
    MID, H = 64, 512            # adapter bottleneck, original-MLP hidden
    SCALE = 0.1

    key = jax.random.PRNGKey(0)
    kx, kp, ku, kb = jax.random.split(key, 4)
    x = jax.random.normal(kx, (B, S, D), jnp.float32)
    params = init_params(kp, D, MID, H)
    # AdaptFormer zero-inits up_proj (adapter path == 0); give it nonzero
    # weights here so the correctness test actually exercises that path.
    params["wu"] = 0.05 * jax.random.normal(ku, (MID, D), jnp.float32)
    params["bu"] = 0.05 * jax.random.normal(kb, (1, D), jnp.float32)

    # tm=128 so the test exercises multiple token tiles + the padding path;
    # the default (tm=512) is the performance setting for real ViT shapes.
    out = adapt_mlp(x, params, scale=SCALE, tm=128)
    out = jax.block_until_ready(out)

    ref = reference(x, params, SCALE)
    assert out.shape == (B, S, D)
    err = float(jnp.max(jnp.abs(out - ref)))
    assert jnp.allclose(out, ref, atol=2e-2, rtol=2e-2), err
    print("KERNEL_OK")
</pallas_src>

<mosaic_0001>
module attributes {stable_mosaic.version = 11 : i64} {
  func.func @adaptmlp_kernel(%arg0: i32, %arg1: memref<128x128xbf16, #tpu.memory_space<vmem>>, %arg2: memref<128x128xbf16, #tpu.memory_space<vmem>>, %arg3: memref<1x128xf32, #tpu.memory_space<vmem>>, %arg4: memref<128x128xbf16, #tpu.memory_space<vmem>>, %arg5: memref<1x128xf32, #tpu.memory_space<vmem>>, %arg6: memref<128x512xbf16, #tpu.memory_space<vmem>>, %arg7: memref<1x512xf32, #tpu.memory_space<vmem>>, %arg8: memref<512x128xbf16, #tpu.memory_space<vmem>>, %arg9: memref<1x128xf32, #tpu.memory_space<vmem>>, %arg10: memref<128x128xf32, #tpu.memory_space<vmem>>) attributes {dimension_semantics = [#tpu.dimension_semantics<parallel>], iteration_bounds = array<i64: 2>, scalar_prefetch = 0 : i64, scratch_operands = 0 : i64, tpu.core_type = #tpu.core_type<tc>, window_params = [{transform_indices = @transform_0, window_bounds = array<i64: 128, 128>}, {pipeline_mode = #tpu.pipeline_mode<synchronous>, transform_indices = @transform_1, window_bounds = array<i64: 128, 128>}, {pipeline_mode = #tpu.pipeline_mode<synchronous>, transform_indices = @transform_2, window_bounds = array<i64: 1, 128>}, {pipeline_mode = #tpu.pipeline_mode<synchronous>, transform_indices = @transform_3, window_bounds = array<i64: 128, 128>}, {pipeline_mode = #tpu.pipeline_mode<synchronous>, transform_indices = @transform_4, window_bounds = array<i64: 1, 128>}, {pipeline_mode = #tpu.pipeline_mode<synchronous>, transform_indices = @transform_5, window_bounds = array<i64: 128, 512>}, {pipeline_mode = #tpu.pipeline_mode<synchronous>, transform_indices = @transform_6, window_bounds = array<i64: 1, 512>}, {pipeline_mode = #tpu.pipeline_mode<synchronous>, transform_indices = @transform_7, window_bounds = array<i64: 512, 128>}, {pipeline_mode = #tpu.pipeline_mode<synchronous>, transform_indices = @transform_8, window_bounds = array<i64: 1, 128>}, {transform_indices = @transform_9, window_bounds = array<i64: 128, 128>}]} {
    %c0 = arith.constant 0 : index
    %c0_0 = arith.constant 0 : index
    %0 = vector.load %arg1[%c0, %c0_0] : memref<128x128xbf16, #tpu.memory_space<vmem>>, vector<128x128xbf16>
    %c0_1 = arith.constant 0 : index
    %c0_2 = arith.constant 0 : index
    %1 = vector.load %arg6[%c0_1, %c0_2] : memref<128x512xbf16, #tpu.memory_space<vmem>>, vector<128x512xbf16>
    %cst = arith.constant dense<0.000000e+00> : vector<128x512xf32>
    %2 = tpu.matmul %0, %1, %cst {dimension_numbers = #tpu.dot_dimension_numbers<[1], [0], [0], [1], [0, 0, 1, 1], [], []>} : vector<128x128xbf16>, vector<128x512xbf16>, vector<128x512xf32> -> vector<128x512xf32>
    %c0_3 = arith.constant 0 : index
    %c0_4 = arith.constant 0 : index
    %3 = vector.load %arg7[%c0_3, %c0_4] : memref<1x512xf32, #tpu.memory_space<vmem>>, vector<1x512xf32>
    %4 = vector.broadcast %3 : vector<1x512xf32> to vector<128x512xf32>
    %5 = arith.addf %2, %4 : vector<128x512xf32>
    %6 = arith.mulf %5, %5 : vector<128x512xf32>
    %7 = arith.mulf %5, %6 : vector<128x512xf32>
    %cst_5 = arith.constant 4.471500e-02 : f32
    %8 = vector.broadcast %cst_5 : f32 to vector<128x512xf32>
    %9 = arith.mulf %8, %7 : vector<128x512xf32>
    %10 = arith.addf %5, %9 : vector<128x512xf32>
    %cst_6 = arith.constant 0.797884583 : f32
    %11 = vector.broadcast %cst_6 : f32 to vector<128x512xf32>
    %12 = arith.mulf %11, %10 : vector<128x512xf32>
    %13 = math.tanh %12 : vector<128x512xf32>
    %cst_7 = arith.constant 1.000000e+00 : f32
    %14 = vector.broadcast %cst_7 : f32 to vector<128x512xf32>
    %15 = arith.addf %14, %13 : vector<128x512xf32>
    %cst_8 = arith.constant 5.000000e-01 : f32
    %16 = vector.broadcast %cst_8 : f32 to vector<128x512xf32>
    %17 = arith.mulf %16, %15 : vector<128x512xf32>
    %18 = arith.mulf %5, %17 : vector<128x512xf32>
    %19 = arith.truncf %18 : vector<128x512xf32> to vector<128x512xbf16>
    %c0_9 = arith.constant 0 : index
    %c0_10 = arith.constant 0 : index
    %20 = vector.load %arg8[%c0_9, %c0_10] : memref<512x128xbf16, #tpu.memory_space<vmem>>, vector<512x128xbf16>
    %cst_11 = arith.constant dense<0.000000e+00> : vector<128x128xf32>
    %21 = tpu.matmul %19, %20, %cst_11 {dimension_numbers = #tpu.dot_dimension_numbers<[1], [0], [0], [1], [0, 0, 1, 1], [], []>} : vector<128x512xbf16>, vector<512x128xbf16>, vector<128x128xf32> -> vector<128x128xf32>
    %c0_12 = arith.constant 0 : index
    %c0_13 = arith.constant 0 : index
    %22 = vector.load %arg2[%c0_12, %c0_13] : memref<128x128xbf16, #tpu.memory_space<vmem>>, vector<128x128xbf16>
    %cst_14 = arith.constant dense<0.000000e+00> : vector<128x128xf32>
    %23 = tpu.matmul %0, %22, %cst_14 {dimension_numbers = #tpu.dot_dimension_numbers<[1], [0], [0], [1], [0, 0, 1, 1], [], []>} : vector<128x128xbf16>, vector<128x128xbf16>, vector<128x128xf32> -> vector<128x128xf32>
    %c0_15 = arith.constant 0 : index
    %c0_16 = arith.constant 0 : index
    %24 = vector.load %arg3[%c0_15, %c0_16] : memref<1x128xf32, #tpu.memory_space<vmem>>, vector<1x128xf32>
    %25 = vector.broadcast %24 : vector<1x128xf32> to vector<128x128xf32>
    %26 = arith.addf %23, %25 : vector<128x128xf32>
    %cst_17 = arith.constant 0.000000e+00 : f32
    %27 = vector.broadcast %cst_17 : f32 to vector<128x128xf32>
    %28 = arith.maximumf %26, %27 : vector<128x128xf32>
    %29 = arith.truncf %28 : vector<128x128xf32> to vector<128x128xbf16>
    %c0_18 = arith.constant 0 : index
    %c0_19 = arith.constant 0 : index
    %30 = vector.load %arg4[%c0_18, %c0_19] : memref<128x128xbf16, #tpu.memory_space<vmem>>, vector<128x128xbf16>
    %cst_20 = arith.constant dense<0.000000e+00> : vector<128x128xf32>
    %31 = tpu.matmul %29, %30, %cst_20 {dimension_numbers = #tpu.dot_dimension_numbers<[1], [0], [0], [1], [0, 0, 1, 1], [], []>} : vector<128x128xbf16>, vector<128x128xbf16>, vector<128x128xf32> -> vector<128x128xf32>
    %c0_21 = arith.constant 0 : index
    %c0_22 = arith.constant 0 : index
    %32 = vector.load %arg9[%c0_21, %c0_22] : memref<1x128xf32, #tpu.memory_space<vmem>>, vector<1x128xf32>
    %33 = vector.broadcast %32 : vector<1x128xf32> to vector<128x128xf32>
    %34 = arith.addf %21, %33 : vector<128x128xf32>
    %35 = arith.addf %34, %31 : vector<128x128xf32>
    %c0_23 = arith.constant 0 : index
    %c0_24 = arith.constant 0 : index
    %36 = vector.load %arg5[%c0_23, %c0_24] : memref<1x128xf32, #tpu.memory_space<vmem>>, vector<1x128xf32>
    %37 = vector.broadcast %36 : vector<1x128xf32> to vector<128x128xf32>
    %38 = arith.addf %35, %37 : vector<128x128xf32>
    %c0_25 = arith.constant 0 : index
    %c0_26 = arith.constant 0 : index
    %39 = vector.load %arg10[%c0_25, %c0_26] : memref<128x128xf32, #tpu.memory_space<vmem>>, vector<128x128xf32>
    tpu.vector_store %arg10[%c0_25, %c0_26], %38 {strides = array<i32>} : memref<128x128xf32, #tpu.memory_space<vmem>>, vector<128x128xf32>,
    return
  }
  func.func @transform_0(%arg0: i32) -> (i32, i32) {
    %c0_i32 = arith.constant 0 : i32
    %c0_i32_0 = arith.constant 0 : i32
    return %arg0, %c0_i32 : i32, i32
  }
  func.func @transform_1(%arg0: i32) -> (i32, i32) {
    %c0_i32 = arith.constant 0 : i32
    %c0_i32_0 = arith.constant 0 : i32
    %c0_i32_1 = arith.constant 0 : i32
    return %c0_i32, %c0_i32_0 : i32, i32
  }
  func.func @transform_2(%arg0: i32) -> (i32, i32) {
    %c0_i32 = arith.constant 0 : i32
    %c0_i32_0 = arith.constant 0 : i32
    %c0_i32_1 = arith.constant 0 : i32
    return %c0_i32, %c0_i32_0 : i32, i32
  }
  func.func @transform_3(%arg0: i32) -> (i32, i32) {
    %c0_i32 = arith.constant 0 : i32
    %c0_i32_0 = arith.constant 0 : i32
    %c0_i32_1 = arith.constant 0 : i32
    return %c0_i32, %c0_i32_0 : i32, i32
  }
  func.func @transform_4(%arg0: i32) -> (i32, i32) {
    %c0_i32 = arith.constant 0 : i32
    %c0_i32_0 = arith.constant 0 : i32
    %c0_i32_1 = arith.constant 0 : i32
    return %c0_i32, %c0_i32_0 : i32, i32
  }
  func.func @transform_5(%arg0: i32) -> (i32, i32) {
    %c0_i32 = arith.constant 0 : i32
    %c0_i32_0 = arith.constant 0 : i32
    %c0_i32_1 = arith.constant 0 : i32
    return %c0_i32, %c0_i32_0 : i32, i32
  }
  func.func @transform_6(%arg0: i32) -> (i32, i32) {
    %c0_i32 = arith.constant 0 : i32
    %c0_i32_0 = arith.constant 0 : i32
    %c0_i32_1 = arith.constant 0 : i32
    return %c0_i32, %c0_i32_0 : i32, i32
  }
  func.func @transform_7(%arg0: i32) -> (i32, i32) {
    %c0_i32 = arith.constant 0 : i32
    %c0_i32_0 = arith.constant 0 : i32
    %c0_i32_1 = arith.constant 0 : i32
    return %c0_i32, %c0_i32_0 : i32, i32
  }
  func.func @transform_8(%arg0: i32) -> (i32, i32) {
    %c0_i32 = arith.constant 0 : i32
    %c0_i32_0 = arith.constant 0 : i32
    %c0_i32_1 = arith.constant 0 : i32
    return %c0_i32, %c0_i32_0 : i32, i32
  }
  func.func @transform_9(%arg0: i32) -> (i32, i32) {
    %c0_i32 = arith.constant 0 : i32
    %c0_i32_0 = arith.constant 0 : i32
    return %arg0, %c0_i32 : i32, i32
  }
}

</mosaic_0001>

<bundles_post_ra>
// kernel: tpu_custom_call.1
= control target key start
LH: loop header
LB: loop body
LE: loop exit
PB: predicated region body
PF: predicated region fallthrough
CT: control target
= control target key end

     0   :  { %s4441_s0 = inlined_call_operand.hbm [shape: bf16[256,128], index: 0, kind: input, shape index: {}]   ;;  %s4442_s1 = inlined_call_operand.hbm [shape: bf16[128,128], index: 1, kind: input, shape index: {}]   ;;  %s4443_s2 = inlined_call_operand.vmem [shape: f32[1,128], index: 2, kind: input, shape index: {}]   ;;  %s4444_s3 = inlined_call_operand.hbm [shape: bf16[128,128], index: 3, kind: input, shape index: {}]   ;;  %s4445_s4 = inlined_call_operand.hbm [shape: f32[1,128], index: 4, kind: input, shape index: {}]   ;;  %s4446_s5 = inlined_call_operand.hbm [shape: bf16[128,512], index: 5, kind: input, shape index: {}]   ;;  %s4447_s6 = inlined_call_operand.vmem [shape: f32[1,512], index: 6, kind: input, shape index: {}]   ;;  %s4448_s7 = inlined_call_operand.hbm [shape: bf16[512,128], index: 7, kind: input, shape index: {}]   ;;  %s4449_s8 = inlined_call_operand.vmem [shape: f32[1,128], index: 8, kind: input, shape index: {}]   ;;  %s4450_s9 = inlined_call_operand.hbm [shape: f32[256,128], index: 9, kind: output, shape index: {}]  }
   0x1   :  { %4453 = sst [smem:[#allocation19_spill]] %s4442_s1 }
   0x2   :  { %4454 = sst [smem:[#allocation20_spill]] %s4444_s3 }
   0x3   :  { %4455 = sst [smem:[#allocation21_spill]] %s4445_s4 }
   0x4   :  { %14 = vsyncpa [#allocation3], 0 }
   0x5   :  { %16 = vsyncpa [#allocation3 + $0x1], 0 }
   0x6   :  { %17 = vsyncpa [#allocation6], 0 }
   0x7   :  { %18 = vsyncpa [#allocation9], 0 }
   0x8   :  { %19 = vsyncpa [#allocation12], 0 }
   0x9   :  { %20 = vsyncpa [#allocation4], 0 }
   0xa   :  { %22 = vsyncpa [#allocation4 + $0x1], 0  ;;  %s3444_s30 = smov 0   ;;  %s3446_s10 = smov 0  }
   0xb   :  { %s3448_s11 = smov 0   ;;  %s3450_s12 = smov 0  }
   0xc LB: > { %s4456_s1 = sld [smem:[#allocation19_spill]]  ;;  %s3468_s16 = sadd.s32 4294967295, %s3381_s12   ;;  %s3381_s12 = sphi %s3450_s12, %s4471_s12   ;;  %s3377_s11 = sphi %s3448_s11, %s4470_s11   ;;  %s3373_s10 = sphi %s3446_s10, %s4469_s10   ;;  %s3369_s30 = sphi %s3444_s30, %s4468_s30  }
   0xd   : > { %p2406_p0 = scmp.ge.s32.totalorder %s3381_s12, 1  ;;  %p49_p1 = scmp.eq.s32.totalorder %s3468_s16, 0 }
   0xe   : > { %p253_p2 = scmp.lt.s32.totalorder %s3381_s12, 3  ;;  %s3383_s18 = smov [#allocation5]  }
   0xf   : > { %s266_s19 = sshll.u32 %s3383_s18, 4  ;;  %s4458_s4 = sld [smem:[#allocation21_spill]]  ;;  %s267_s19 = int_to_ptr.vmem [resolvable:$true] %s266_s19 }
  0x10   : > { %p3473_p3 = pnand %p2406_p0, %p253_p2  ;;  %s4460_s3 = sld [smem:[#allocation20_spill]] }
  0x11   : > { %s3384_s27 = smov [#allocation8]   ;;  %s4451_s29 = smov 64  }
  0x12   : > { %s264_s15 = sshll.u32 %s4456_s1, 4  ;;  %p2911_p4 = pneg %p3473_p3  ;;  %s265_s15 = int_to_ptr.hbm [resolvable:$true] %s264_s15 }
  0x13   : > { %s298_s28 = sshll.u32 %s3384_s27, 4  ;;  %s4452_s13 = smov 4   ;;  %s299_s28 = int_to_ptr.vmem [resolvable:$true] %s298_s28 }
  0x14   : > { %p3485_p6 = pnand %p2911_p4, %p49_p1  ;;  %s307_s20 = sshll.u32 %s4446_s5, 4  ;;  %s308_s20 = int_to_ptr.hbm [resolvable:$true] %s307_s20 }
  0x15   : > { %s296_s22 = sshll.u32 %s4458_s4, 4  ;;  %s3387_s21 = smov [#allocation7]   ;;  %s297_s22 = int_to_ptr.hbm [resolvable:$true] %s296_s22 }
  0x16   : > { %s281_s26 = sshll.u32 %s4460_s3, 4  ;;  %s283_s24 = sshll.u32 %s3387_s21, 4  ;;  %s282_s26 = int_to_ptr.hbm [resolvable:$true] %s281_s26  ;;  %s284_s24 = int_to_ptr.vmem [resolvable:$true] %s283_s24 }
  0x17   : > { %2914 = dma.hbm_to_vmem [thread:$0]  (!%p3485_p6), %s265_s15, 1024, %s267_s19, [#allocation6], %s4451_s29, %s4451_s29, %s4452_s13  }
  0x18   : > { %2920 = dma.hbm_to_vmem [thread:$0]  (!%p3485_p6), %s297_s22, 16, %s299_s28, [#allocation9]  }
  0x19   : > { %2917 = dma.hbm_to_vmem [thread:$0]  (!%p3485_p6), %s282_s26, 1024, %s284_s24, [#allocation6], %s4451_s29, %s4451_s29, %s4452_s13  }
  0x1a   : > { %s3388_s15 = smov [#allocation10]   ;;  %s3389_s22 = smov 256  }
  0x1b   : > { %s309_s19 = sshll.u32 %s3388_s15, 4  ;;  %s3390_s25 = smov 16   ;;  %s310_s19 = int_to_ptr.vmem [resolvable:$true] %s309_s19 }
  0x1c   : > { %2923 = dma.hbm_to_vmem [thread:$0]  (!%p3485_p6), %s308_s20, 4096, %s310_s19, [#allocation9], %s3389_s22, %s3389_s22, %s3390_s25  }
  0x1d   : > { %s324_s14 = sshll.u32 %s4448_s7, 4  ;;  %s3391_s26 = smov [#allocation11]   ;;  %s325_s14 = int_to_ptr.hbm [resolvable:$true] %s324_s14 }
  0x1e   : > { %s326_s18 = sshll.u32 %s3391_s26, 4  ;;  %s2405_s21 = sadd.s32 4294967294, %s3381_s12   ;;  %s327_s18 = int_to_ptr.vmem [resolvable:$true] %s326_s18 }
  0x1f   : > { %2926 = dma.hbm_to_vmem [thread:$0]  (!%p3485_p6), %s325_s14, 4096, %s327_s18, [#allocation12], %s4451_s29, %s4451_s29, %s4452_s13  }
  0x20   : > { %s3519_s24 = sadd.s32 1, %s3381_s12   ;;  %s35_s20 = sadd.s32 1, %s3377_s11 }
  0x21   : > { %s32_s15 = ssub.s32 %s3381_s12, %s3519_s24  ;;  %p42_p7 = scmp.ne.s32.totalorder %s3377_s11, %s3373_s10 }
  0x22   : > { %p33_p8 = scmp.eq.s32.totalorder %s32_s15, 0  ;;  %p43_p9 = scmp.eq.s32.totalorder %s3381_s12, 0 }
  0x23   : > { %p48_p10 = scmp.ne.s32.totalorder %s3373_s10, %s3369_s30  ;;  %p240_p11 = scmp.eq.s32.totalorder %s3468_s16, 1 }
  0x24   : > { %s3531_s19 = scalar_select %p33_p8, %s3377_s11, %s35_s20  }
  0x25   : > { %p3535_p12 = por %p49_p1, %p48_p10  ;;  %p3539_p13 = por %p240_p11, %p42_p7 }
  0x26   : > { %p246_p0 = scmp.eq.s32.totalorder %s2405_s21, 1  ;;  %p44_p2 = por %p43_p9, %p42_p7 }
  0x27   : > { %s343_s25 = sand.u32 1, %s3377_s11   ;;  %p2940_p6 = scmp.lt.s32.totalorder %s3381_s12, 2 }
  0x28   : > { %p3544_p4 = por %p246_p0, %p48_p10  ;;  %s2413_s28 = sshll.u32 %s343_s25, 6 }
  0x29   : > { %s2781_s14 = sshll.u32 %s3381_s12, 6  ;;  %s347_s29 = scalar_lea.vmem [#allocation2], %s2413_s28 }
  0x2a   : > { %s352_s20 = scalar_lea.hbm %s4441_s0, %s2781_s14  ;;  %s355_s13 = sshll.u32 %s347_s29, 4  ;;  %s356_s13 = int_to_ptr.vmem [resolvable:$true] %s355_s13 }
  0x2b   : > { %s353_s15 = sshll.u32 %s352_s20, 4  ;;  %p3553_p8 = pnand %p2940_p6, %p44_p2  ;;  %s354_s15 = int_to_ptr.hbm [resolvable:$true] %s353_s15 }
  0x2c   : > { %s344_s1 = scalar_lea.sflag [#allocation3], %s343_s25  ;;  %s3273_s3 = sshra.s32 %s354_s15, 4  ;;  %s3274_s3 = int_to_ptr.hbm [resolvable:$true] %s3273_s3 }
  0x2d   : > { %s3275_s4 = scalar_lea.hbm %s3274_s3, 64  ;;  %p3277_p9 = pneg %p3553_p8 }
  0x2e   : > { %p3276_p7 = scmp.ne.s32.totalorder %s3274_s3, %s3275_s4  ;;  %s3280_s29 = scalar_lea.hbm %s4441_s0, 128 }
  0x2f   : > { %p3281_p0 = scmp.lt.s32.totalorder %s3274_s3, %s4441_s0  ;;  %p3282_p2 = scmp.lt.s32.totalorder %s3280_s29, %s3275_s4 }
  0x30   : > { %p3278_p10 = pnand %p3277_p9, %p3276_p7 }
  0x31   : > { %p3283_p6 = por %p3282_p2, %p3281_p0 }
  0x32   : > { %p3279_p11 = pneg %p3278_p10 }
  0x34   : > { %p3284_p5 = pnand %p3283_p6, %p3279_p11 }
  0x36   : > { %3287 = shalt.err (!%p3284_p5)
}
  0x37   : > { %s4465_s25 = smov 4   ;;  %s4466_s20 = smov 64  }
  0x38   : > { %2930 = dma.hbm_to_vmem [thread:$0]  (!%p3553_p8), %s354_s15, 1024, %s356_s13, %s344_s1, %s4466_s20, %s4466_s20, %s4465_s25  }
  0x39   : > { %367 = sbr.rel (%p3473_p3) target bundleno = 691 (0x2b3), region = 56  ;;  %s3573_s14 = sand.u32 (!%p3473_p3), 1, %s3373_s10  }
  0x3a   : > { %s2417_s3 = sshll.u32 (!%p3473_p3), %s3573_s14, 6  ;;  %s370_s4 = scalar_lea.sflag (!%p3473_p3), [#allocation3], %s3573_s14 }
  0x3b   : > { %s3577_s26 = scalar_lea.vmem (!%p3473_p3), [#allocation2], %s2417_s3 }
  0x3e   : > { %3348 = dma.done.wait (%p3535_p12), %s370_s4, 1024  }
  0x3f   : > { %3350 = vsyncadd (%p3535_p12), %s370_s4, 4294966272 }
  0x40   : > { %3352 = dma.done.wait (%p49_p1), [#allocation6], 2048  }
  0x41   : > { %3354 = vsyncadd (%p49_p1), [#allocation6], 4294965248 }
  0x42   : > { %3356 = dma.done.wait (%p49_p1), [#allocation9], 4112  }
  0x43   : > { %3358 = vsyncadd (%p49_p1), [#allocation9], 4294963184 }
  0x44   : > { %3360 = dma.done.wait (%p49_p1), [#allocation12], 4096  }
  0x45   : > { %3362 = vsyncadd (%p49_p1), [#allocation12], 4294963200  ;;  %v2570_v0 = vld [vmem:[#allocation10 + $0xe0] sm:$0xf]  ;;  %v2820_v1 = vld [vmem:[#allocation10 + $0xec] sm:$0xf0] }
  0x46   : > { %v2818_v2 = vld [vmem:[#allocation10 + $0xe4] sm:$0xf]  ;;  %v2571_v3 = vor.u32 %v2820_v1, %v2570_v0  ;;  %v2572_v4 = vld [vmem:[#allocation10 + $0xf0] sm:$0xf0]  ;;  %v2554_v5 = vld [vmem:[#allocation10 + $0xc0] sm:$0xf] }
  0x47   : > { %v2816_v6 = vld [vmem:[#allocation10 + $0xcc] sm:$0xf0]  ;;  %v2575_v7 = vor.u32 %v2818_v2, %v2572_v4  ;;  %v2814_v8 = vld [vmem:[#allocation10 + $0xc4] sm:$0xf]  ;;  %v2556_v9 = vld [vmem:[#allocation10 + $0xd0] sm:$0xf0] }
  0x48   : > { %702 = vmatpush.bf16.msra.mxu0 %v2571_v3  ;;  %2871 = vmatpush.bf16.msra.mxu2 %v2571_v3  ;;  %v2555_v10 = vor.u32 %v2816_v6, %v2554_v5  ;;  %v2559_v11 = vor.u32 %v2814_v8, %v2556_v9  ;;  %v2538_v12 = vld [vmem:[#allocation10 + $0xa0] sm:$0xf]  ;;  %v2812_v13 = vld [vmem:[#allocation10 + $0xac] sm:$0xf0]  ;;  %v2810_v14 = vld [vmem:[#allocation10 + $0xa4] sm:$0xf] }
  0x49   : > { %2879 = vmatpush.bf16.msra.mxu3 %v2575_v7  ;;  %751 = vmatpush.bf16.msra.mxu1 %v2575_v7  ;;  %v2540_v15 = vld [vmem:[#allocation10 + $0xb0] sm:$0xf0]  ;;  %v2539_v16 = vor.u32 %v2812_v13, %v2538_v12  ;;  %v2522_v18 = vld [vmem:[#allocation10 + $0x80] sm:$0xf]  ;;  %v2808_v19 = vld [vmem:[#allocation10 + $0x8c] sm:$0xf0] }
  0x4a   : > { %v2543_v17 = vor.u32 %v2810_v14, %v2540_v15  ;;  %v2806_v20 = vld [vmem:[#allocation10 + $0x84] sm:$0xf]  ;;  %v2524_v21 = vld [vmem:[#allocation10 + $0x90] sm:$0xf0]  ;;  %v2523_v22 = vor.u32 %v2808_v19, %v2522_v18  ;;  %v2506_v23 = vld [vmem:[#allocation10 + $0x60] sm:$0xf] }
  0x4b   : > { %v2527_v24 = vor.u32 %v2806_v20, %v2524_v21  ;;  %v2804_v25 = vld [vmem:[#allocation10 + $0x6c] sm:$0xf0]  ;;  %v2802_v26 = vld [vmem:[#allocation10 + $0x64] sm:$0xf]  ;;  %v2508_v27 = vld [vmem:[#allocation10 + $0x70] sm:$0xf0] }
  0x4c   : > { %703 = vmatpush.bf16.msra.mxu0 %v2555_v10  ;;  %2872 = vmatpush.bf16.msra.mxu2 %v2555_v10  ;;  %v2507_v28 = vor.u32 %v2804_v25, %v2506_v23  ;;  %v2511_v29 = vor.u32 %v2802_v26, %v2508_v27  ;;  %v2490_v30 = vld [vmem:[#allocation10 + $0x40] sm:$0xf]  ;;  %v2800_v31 = vld [vmem:[#allocation10 + $0x4c] sm:$0xf0]  ;;  %v2798_v32 = vld [vmem:[#allocation10 + $0x44] sm:$0xf] }
  0x4d   : > { %2880 = vmatpush.bf16.msra.mxu3 %v2559_v11  ;;  %752 = vmatpush.bf16.msra.mxu1 %v2559_v11  ;;  %v2492_v33 = vld [vmem:[#allocation10 + $0x50] sm:$0xf0]  ;;  %v2491_v34 = vor.u32 %v2800_v31, %v2490_v30  ;;  %v2474_v36 = vld [vmem:[#allocation10 + $0x20] sm:$0xf]  ;;  %v2796_v37 = vld [vmem:[#allocation10 + $0x2c] sm:$0xf0] }
  0x4e   : > { %v2495_v35 = vor.u32 %v2798_v32, %v2492_v33  ;;  %v2794_v38 = vld [vmem:[#allocation10 + $0x24] sm:$0xf]  ;;  %v2476_v39 = vld [vmem:[#allocation10 + $0x30] sm:$0xf0]  ;;  %v2475_v40 = vor.u32 %v2796_v37, %v2474_v36  ;;  %v2458_v42 = vld [vmem:[#allocation10] sm:$0xf] }
  0x4f   : > { %v2479_v41 = vor.u32 %v2794_v38, %v2476_v39  ;;  %v2792_v43 = vld [vmem:[#allocation10 + $0xc] sm:$0xf0]  ;;  %v2790_v44 = vld [vmem:[#allocation10 + $0x4] sm:$0xf]  ;;  %v2460_v45 = vld [vmem:[#allocation10 + $0x10] sm:$0xf0] }
  0x50   : > { %704 = vmatpush.bf16.msra.mxu0 %v2539_v16  ;;  %2873 = vmatpush.bf16.msra.mxu2 %v2539_v16  ;;  %v2459_v46 = vor.u32 %v2792_v43, %v2458_v42  ;;  %v2463_v47 = vor.u32 %v2790_v44, %v2460_v45  ;;  %v2861_v48 = vld [vmem:[#allocation5 + $0x38] sm:$0xff]  ;;  %v3596_v49 = vld [vmem:[%s3577_s26] sm:$0xff]  ;;  %v2860_v51 = vld [vmem:[#allocation5 + $0x30] sm:$0xff]  ;;  %s2423_s20 = sshll.u32 %s3573_s14, 7  ;;  %s2870_s4 = sshll.u32 %s3468_s16, 7 }
  0x51   : > { %2881 = vmatpush.bf16.msra.mxu3 %v2543_v17  ;;  %753 = vmatpush.bf16.msra.mxu1 %v2543_v17  ;;  %v3599_v50 = vld [vmem:[%s3577_s26 + $0x20] sm:$0xff]  ;;  %v2578_v52 = vld [vmem:[#allocation10 + $0xe8] sm:$0xf]  ;;  %v2821_v53 = vld [vmem:[#allocation10 + $0xf4] sm:$0xf0]  ;;  %s4345_s3 = scalar_lea.vmem [#allocation13], %s2423_s20  ;;  %s2280_s17 = scalar_lea.hbm %s4450_s9, %s2870_s4 }
  0x52   : > { %v2579_v54 = vor.u32 %v2821_v53, %v2578_v52  ;;  %v2819_v55 = vld [vmem:[#allocation10 + $0xec] sm:$0xf]  ;;  %v2580_v56 = vld [vmem:[#allocation10 + $0xf8] sm:$0xf0]  ;;  %v2562_v58 = vld [vmem:[#allocation10 + $0xc8] sm:$0xf] }
  0x53   : > { %v2583_v57 = vor.u32 %v2819_v55, %v2580_v56  ;;  %v2817_v59 = vld [vmem:[#allocation10 + $0xd4] sm:$0xf0]  ;;  %v2859_v60 = vld [vmem:[#allocation5 + $0x28] sm:$0xff]  ;;  %v2564_v62 = vld [vmem:[#allocation10 + $0xd8] sm:$0xf0]  ;;  %s2281_s13 = sshll.u32 %s4345_s3, 4  ;;  %s2282_s13 = int_to_ptr.vmem [resolvable:$true] %s2281_s13 }
  0x54   : > { %705 = vmatpush.bf16.msra.mxu0 %v2523_v22  ;;  %2874 = vmatpush.bf16.msra.mxu2 %v2523_v22  ;;  %v2815_v61 = vld [vmem:[#allocation10 + $0xcc] sm:$0xf]  ;;  %v2563_v63 = vor.u32 %v2817_v59, %v2562_v58  ;;  %v2546_v1 = vld [vmem:[#allocation10 + $0xa8] sm:$0xf]  ;;  %v2813_v2 = vld [vmem:[#allocation10 + $0xb4] sm:$0xf0] }
  0x55   : > { %2882 = vmatpush.bf16.msra.mxu3 %v2527_v24  ;;  %754 = vmatpush.bf16.msra.mxu1 %v2527_v24  ;;  %v2567_v0 = vor.u32 %v2815_v61, %v2564_v62  ;;  %v2811_v3 = vld [vmem:[#allocation10 + $0xac] sm:$0xf]  ;;  %v2548_v4 = vld [vmem:[#allocation10 + $0xb8] sm:$0xf0]  ;;  %v2547_v6 = vor.u32 %v2813_v2, %v2546_v1  ;;  %v2530_v8 = vld [vmem:[#allocation10 + $0x88] sm:$0xf] }
  0x56   : > { %v2858_v5 = vld [vmem:[#allocation5 + $0x20] sm:$0xff]  ;;  %v2551_v7 = vor.u32 %v2811_v3, %v2548_v4  ;;  %v2809_v9 = vld [vmem:[#allocation10 + $0x94] sm:$0xf0]  ;;  %v2807_v10 = vld [vmem:[#allocation10 + $0x8c] sm:$0xf]  ;;  %s2283_s23 = sshll.u32 %s2280_s17, 4  ;;  %s2284_s23 = int_to_ptr.hbm [resolvable:$true] %s2283_s23 }
  0x57   : > { %v2532_v11 = vld [vmem:[#allocation10 + $0x98] sm:$0xf0]  ;;  %v2531_v13 = vor.u32 %v2809_v9, %v2530_v8  ;;  %v3606_v15 = vld [vmem:[%s3577_s26 + $0x8] sm:$0xff]  ;;  %v2856_v17 = vld [vmem:[#allocation5 + $0x10] sm:$0xff]  ;;  %s2269_s16 = scalar_lea.sflag [#allocation4], %s3573_s14  ;;  %s3317_s15 = sshra.s32 %s2284_s23, 4  ;;  %s3318_s15 = int_to_ptr.hbm [resolvable:$true] %s3317_s15 }
  0x58   : > { %706 = vmatpush.bf16.msra.mxu0 %v2507_v28  ;;  %2875 = vmatpush.bf16.msra.mxu2 %v2507_v28  ;;  %v2857_v12 = vld [vmem:[#allocation5 + $0x18] sm:$0xff]  ;;  %v2535_v14 = vor.u32 %v2807_v10, %v2532_v11  ;;  %v3609_v16 = vld [vmem:[%s3577_s26 + $0x28] sm:$0xff]  ;;  %v2784_v44 = vld [vmem:[%s3577_s26 + $0x10] sm:$0xff]  ;;  %s3319_s21 = scalar_lea.hbm %s3318_s15, 128  ;;  %s3323_s18 = scalar_lea.hbm %s4450_s9, 256 }
  0x59   : > { %2883 = vmatpush.bf16.msra.mxu3 %v2511_v29  ;;  %755 = vmatpush.bf16.msra.mxu1 %v2511_v29  ;;  %v2514_v18 = vld [vmem:[#allocation10 + $0x68] sm:$0xf]  ;;  %v2805_v19 = vld [vmem:[#allocation10 + $0x74] sm:$0xf0]  ;;  %v2803_v21 = vld [vmem:[#allocation10 + $0x6c] sm:$0xf]  ;;  %p3320_p1 = scmp.ne.s32.totalorder %s3318_s15, %s3319_s21  ;;  %p3324_p12 = scmp.lt.s32.totalorder %s3318_s15, %s4450_s9 }
  0x5a   : > { %v2515_v20 = vor.u32 %v2805_v19, %v2514_v18  ;;  %v2516_v22 = vld [vmem:[#allocation10 + $0x78] sm:$0xf0]  ;;  %v2498_v24 = vld [vmem:[#allocation10 + $0x48] sm:$0xf]  ;;  %v2801_v25 = vld [vmem:[#allocation10 + $0x54] sm:$0xf0]  ;;  %p3325_p8 = scmp.lt.s32.totalorder %s3323_s18, %s3319_s21 }
  0x5b   : > { %v2519_v23 = vor.u32 %v2803_v21, %v2516_v22  ;;  %v2855_v26 = vld [vmem:[#allocation5 + $0x8] sm:$0xff]  ;;  %v2500_v28 = vld [vmem:[#allocation10 + $0x58] sm:$0xf0]  ;;  %v2499_v29 = vor.u32 %v2801_v25, %v2498_v24  ;;  %v2797_v32 = vld [vmem:[#allocation10 + $0x34] sm:$0xf0]  ;;  %p3321_p3 = pnand %p3320_p1, %p3539_p13 }
  0x5c   : > { %707 = vmatpush.bf16.msra.mxu0 %v2491_v34  ;;  %2876 = vmatpush.bf16.msra.mxu2 %v2491_v34  ;;  %v2799_v27 = vld [vmem:[#allocation10 + $0x4c] sm:$0xf]  ;;  %v2482_v31 = vld [vmem:[#allocation10 + $0x28] sm:$0xf]  ;;  %v2484_v34 = vld [vmem:[#allocation10 + $0x38] sm:$0xf0]  ;;  %p3326_p7 = por %p3325_p8, %p3324_p12 }
  0x5d   : > { %2884 = vmatpush.bf16.msra.mxu3 %v2495_v35  ;;  %756 = vmatpush.bf16.msra.mxu1 %v2495_v35  ;;  %v2503_v30 = vor.u32 %v2799_v27, %v2500_v28  ;;  %v2795_v33 = vld [vmem:[#allocation10 + $0x2c] sm:$0xf]  ;;  %v2854_v35 = vld [vmem:[#allocation5] sm:$0xff]  ;;  %v2483_v36 = vor.u32 %v2797_v32, %v2482_v31  ;;  %v2466_v38 = vld [vmem:[#allocation10 + $0x8] sm:$0xf]  ;;  %p3322_p5 = pneg %p3321_p3 }
  0x5e   : > { %v2487_v37 = vor.u32 %v2795_v33, %v2484_v34  ;;  %v2793_v39 = vld [vmem:[#allocation10 + $0x14] sm:$0xf0]  ;;  %v3617_v45 = vld [vmem:[%s3577_s26 + $0x30] sm:$0xff]  ;;  %v2867_v62 = vld [vmem:[#allocation7 + $0x28] sm:$0xff] }
  0x5f   : > { %v2467_v42 = vor.u32 %v2793_v39, %v2466_v38  ;;  %v2869_v52 = vld [vmem:[#allocation7 + $0x38] sm:$0xff]  ;;  %v2868_v55 = vld [vmem:[#allocation7 + $0x30] sm:$0xff]  ;;  %v2826_v4 = vld [vmem:[#allocation11 + $0x20] sm:$0xff]  ;;  %p3327_p9 = pnand %p3326_p7, %p3322_p5 }
  0x60   : > { %708 = vmatpush.bf16.msra.mxu0 %v2475_v40  ;;  %2877 = vmatpush.bf16.msra.mxu2 %v2475_v40  ;;  %v2791_v40 = vld [vmem:[#allocation10 + $0xc] sm:$0xf]  ;;  %v2829_v53 = vld [vmem:[#allocation11 + $0x38] sm:$0xff]  ;;  %v2828_v59 = vld [vmem:[#allocation11 + $0x30] sm:$0xff] }
  0x61   : > { %2885 = vmatpush.bf16.msra.mxu3 %v2479_v41  ;;  %757 = vmatpush.bf16.msra.mxu1 %v2479_v41  ;;  %v2468_v41 = vld [vmem:[#allocation10 + $0x18] sm:$0xf0]  ;;  %v2824_v21 = vld [vmem:[#allocation11 + $0x10] sm:$0xff]  ;;  %v2823_v28 = vld [vmem:[#allocation11 + $0x8] sm:$0xff] }
  0x62   : > { %v2471_v43 = vor.u32 %v2791_v40, %v2468_v41  ;;  %v2825_v11 = vld [vmem:[#allocation11 + $0x18] sm:$0xff]  ;;  %v2832_v22 = vld [vmem:[#allocation11 + $0x50] sm:$0xff]  ;;  %v2822_v38 = vld [vmem:[#allocation11] sm:$0xff] }
  0x63   : > { %v2830_v39 = vld [vmem:[#allocation11 + $0x40] sm:$0xff] }
  0x64   : > { %709 = vmatpush.bf16.msra.mxu0 %v2459_v46  ;;  %2878 = vmatpush.bf16.msra.mxu2 %v2459_v46  ;;  %v2785_v46 = vld [vmem:[%s3577_s26 + $0x18] sm:$0xff] }
  0x65   : > { %2886 = vmatpush.bf16.msra.mxu3 %v2463_v47  ;;  %758 = vmatpush.bf16.msra.mxu1 %v2463_v47  ;;  %v3623_v47 = vld [vmem:[%s3577_s26 + $0x38] sm:$0xff] }
  0x67   : > { %710 = vmatmul.bf16.vlgmr.msra.gmra.mxu0 %v3596_v49  ;;  %730 = vmatmul.bf16.vlgmr.msra.gmra.mxu2 %v3599_v50 }
  0x68   : > { %1638 = vmatpush.bf16.msrb.mxu0 %v2861_v48  ;;  %779 = vmatmul.bf16.vlgmr.msra.gmra.mxu3 %v3599_v50 }
  0x69   : > { %759 = vmatmul.bf16.vlgmr.msra.gmra.mxu1 %v3596_v49  ;;  %800 = vmatpush.bf16.msrb.mxu2 %v2579_v54  ;;  %v2837_v54 = vld [vmem:[#allocation11 + $0x78] sm:$0xff] }
  0x6a   : > { %849 = vmatpush.bf16.msrb.mxu3 %v2583_v57  ;;  %1775 = vmatpush.bf16.msrb.mxu1 %v2869_v52 }
  0x6c   : > { %1639 = vmatpush.bf16.msrb.mxu0 %v2860_v51  ;;  %v3636_v51 = vld [vmem:[%s4447_s6] sm:$0xf] }
  0x6d   : > { %801 = vmatpush.bf16.msrb.mxu2 %v2563_v63  ;;  %v3642_v56 = vperm.slane %v3636_v51, 0  ;;  %v3648_v1 = vperm.slane %v3636_v51, 1 }
  0x6e   : > { %850 = vmatpush.bf16.msrb.mxu3 %v2567_v0  ;;  %1776 = vmatpush.bf16.msrb.mxu1 %v2868_v55  ;;  %v2835_v0 = vld [vmem:[#allocation11 + $0x68] sm:$0xff] }
  0x70   : > { %1640 = vmatpush.bf16.msrb.mxu0 %v2859_v60  ;;  %v2836_v60 = vld [vmem:[#allocation11 + $0x70] sm:$0xff] }
  0x71   : > { %802 = vmatpush.bf16.msrb.mxu2 %v2547_v6 }
  0x72   : > { %851 = vmatpush.bf16.msrb.mxu3 %v2551_v7  ;;  %1777 = vmatpush.bf16.msrb.mxu1 %v2867_v62 }
  0x74   : > { %1641 = vmatpush.bf16.msrb.mxu0 %v2858_v5  ;;  %v2834_v5 = vld [vmem:[#allocation11 + $0x60] sm:$0xff] }
  0x75   : > { %803 = vmatpush.bf16.msrb.mxu2 %v2531_v13 }
  0x76   : > { %852 = vmatpush.bf16.msrb.mxu3 %v2535_v14  ;;  %v2866_v14 = vld [vmem:[#allocation7 + $0x20] sm:$0xff] }
  0x77   : > { %715 = vmatmul.bf16.gmra.mxu0 %v3606_v15  ;;  %735 = vmatmul.bf16.gmra.mxu2 %v3609_v16 }
  0x78   : > { %1642 = vmatpush.bf16.msrb.mxu0 %v2857_v12  ;;  %784 = vmatmul.bf16.gmra.mxu3 %v3609_v16  ;;  %v2833_v12 = vld [vmem:[#allocation11 + $0x58] sm:$0xff] }
  0x79   : > { %764 = vmatmul.bf16.gmra.mxu1 %v3606_v15  ;;  %804 = vmatpush.bf16.msrb.mxu2 %v2515_v20 }
  0x7a   : > { %853 = vmatpush.bf16.msrb.mxu3 %v2519_v23  ;;  %1778 = vmatpush.bf16.msrb.mxu1 %v2866_v14 }
  0x7c   : > { %1643 = vmatpush.bf16.msrb.mxu0 %v2856_v17 }
  0x7d   : > { %805 = vmatpush.bf16.msrb.mxu2 %v2499_v29  ;;  %v2831_v29 = vld [vmem:[#allocation11 + $0x48] sm:$0xff] }
  0x7e   : > { %854 = vmatpush.bf16.msrb.mxu3 %v2503_v30 }
  0x80   : > { %1644 = vmatpush.bf16.msrb.mxu0 %v2855_v26  ;;  %v2865_v26 = vld [vmem:[#allocation7 + $0x18] sm:$0xff] }
  0x81   : > { %806 = vmatpush.bf16.msrb.mxu2 %v2483_v36  ;;  %1779 = vmatpush.bf16.msrb.mxu1 %v2865_v26 }
  0x82   : > { %855 = vmatpush.bf16.msrb.mxu3 %v2487_v37 }
  0x84   : > { %1645 = vmatpush.bf16.msrb.mxu0 %v2854_v35 }
  0x85   : > { %807 = vmatpush.bf16.msrb.mxu2 %v2467_v42 }
  0x86   : > { %856 = vmatpush.bf16.msrb.mxu3 %v2471_v43 }
  0x87   : > { %720 = vmatmul.bf16.gmra.mxu0 %v2784_v44  ;;  %740 = vmatmul.bf16.gmra.mxu2 %v3617_v45 }
  0x88   : > { %789 = vmatmul.bf16.gmra.mxu3 %v3617_v45 }
  0x89   : > { %769 = vmatmul.bf16.gmra.mxu1 %v2784_v44  ;;  %2020 = vmatpush.bf16.msra.mxu2 %v2829_v53 }
  0x8a   : > { %2069 = vmatpush.bf16.msra.mxu3 %v2837_v54  ;;  %v2864_v54 = vld [vmem:[#allocation7 + $0x10] sm:$0xff] }
  0x8b   : > { %1780 = vmatpush.bf16.msrb.mxu1 %v2864_v54 }
  0x8d   : > { %2021 = vmatpush.bf16.msra.mxu2 %v2828_v59 }
  0x8e   : > { %2070 = vmatpush.bf16.msra.mxu3 %v2836_v60 }
  0x92   : > { %2071 = vmatpush.bf16.msra.mxu3 %v2835_v0 }
  0x96   : > { %2072 = vmatpush.bf16.msra.mxu3 %v2834_v5 }
  0x97   : > { %725 = vmatmul.bf16.gmra.mxu0 %v2785_v46  ;;  %745 = vmatmul.bf16.gmra.mxu2 %v3623_v47 }
  0x98   : > { %794 = vmatmul.bf16.gmra.mxu3 %v3623_v47 }
  0x99   : > { %774 = vmatmul.bf16.gmra.mxu1 %v2785_v46 }
  0x9a   : > { %2073 = vmatpush.bf16.msra.mxu3 %v2833_v12 }
  0x9e   : > { %2074 = vmatpush.bf16.msra.mxu3 %v2832_v22 }
  0xa2   : > { %2075 = vmatpush.bf16.msra.mxu3 %v2831_v29 }
  0xa6   : > { %2076 = vmatpush.bf16.msra.mxu3 %v2830_v39 }
  0xa7   : > { %808 = vmatmul.bf16.vlgmr.msrb.gmra.mxu2 %v3596_v49  ;;  %1646 = vmatmul.bf16.vlgmr.msrb.gmra.mxu0 %v3596_v49 }
  0xa8   : > { %857 = vmatmul.bf16.vlgmr.msrb.gmra.mxu3 %v3596_v49 }
  0xb7   : > { %813 = vmatmul.bf16.gmra.mxu2 %v3606_v15  ;;  %1651 = vmatmul.bf16.gmra.mxu0 %v3606_v15 }
  0xb8   : > { %862 = vmatmul.bf16.gmra.mxu3 %v3606_v15 }
  0xc7   : > { %818 = vmatmul.bf16.gmra.mxu2 %v2784_v44  ;;  %1656 = vmatmul.bf16.gmra.mxu0 %v2784_v44 }
  0xc8   : > { %867 = vmatmul.bf16.gmra.mxu3 %v2784_v44 }
  0xd7   : > { %823 = vmatmul.bf16.gmra.mxu2 %v2785_v46  ;;  %1661 = vmatmul.bf16.gmra.mxu0 %v2785_v46 }
  0xd8   : > { %872 = vmatmul.bf16.gmra.mxu3 %v2785_v46 }
  0xe4   : > { %v711_v48 = vpop.f32.mrf.mxu0 }
  0xe5   : > { %v3654_v7 = vadd.f32 %v711_v48, %v3642_v56 }
  0xe6   : > { %v760_v49 = vpop.f32.mrf.mxu1 }
  0xe7   : > { %828 = vmatmul.bf16.gmra.mxu2 %v3599_v50  ;;  %1666 = vmatmul.bf16.gmra.mxu0 %v3599_v50  ;;  %v3657_v8 = vadd.f32 %v760_v49, %v3648_v1  ;;  %v898_v15 = vmul.f32 %v3654_v7, %v3654_v7 }
  0xe8   : > { %877 = vmatmul.bf16.gmra.mxu3 %v3599_v50  ;;  %v2827_v50 = vld [vmem:[#allocation11 + $0x28] sm:$0xff] }
  0xe9   : > { %2022 = vmatpush.bf16.msra.mxu2 %v2827_v50  ;;  %v899_v18 = vmul.f32 %v3657_v8, %v3657_v8  ;;  %v962_v24 = vmul.f32 %v898_v15, %v3654_v7 }
  0xea   : > { %v731_v57 = vpop.f32.mrf.mxu2 }
  0xeb   : > { %v3645_v58 = vadd.f32 %v731_v57, %v3642_v56  ;;  %v963_v25 = vmul.f32 %v899_v18, %v3657_v8  ;;  %v1026_v32 = vmul.f32 0.044715, %v962_v24  ;;  %v780_v33 = vpop.f32.mrf.mxu3 }
  0xec   : > { %v713_v61 = vpop.f32.mrf.mxu0  ;;  %v3690_v43 = vadd.f32 %v780_v33, %v3648_v1 }
  0xed   : > { %2023 = vmatpush.bf16.msra.mxu2 %v2826_v4  ;;  %v3665_v13 = vadd.f32 %v713_v61, %v3642_v56  ;;  %v1027_v35 = vmul.f32 0.044715, %v963_v25  ;;  %v1090_v42 = vadd.f32 %v1026_v32, %v3654_v7  ;;  %v930_v52 = vmul.f32 %v3645_v58, %v3645_v58 }
  0xee   : > { %v762_v63 = vpop.f32.mrf.mxu1  ;;  %v931_v60 = vmul.f32 %v3690_v43, %v3690_v43 }
  0xef   : > { %v3662_v10 = vadd.f32 %v762_v63, %v3648_v1  ;;  %v1091_v46 = vadd.f32 %v1027_v35, %v3657_v8  ;;  %v1154_v59 = vmul.f32 0.7978846, %v1090_v42 }
  0xf0   : > { %v995_v15 = vmul.f32 %v931_v60, %v3690_v43 }
  0xf1   : > { %2024 = vmatpush.bf16.msra.mxu2 %v2825_v11  ;;  %v903_v20 = vmul.f32 %v3662_v10, %v3662_v10  ;;  %v1155_v62 = vmul.f32 0.7978846, %v1091_v46  ;;  %2993 = vtanh.f32 %v1154_v59 }
  0xf2   : > { %v733_v2 = vpop.f32.mrf.mxu2  ;;  %v1059_v24 = vmul.f32 0.044715, %v995_v15 }
  0xf3   : > { %v3651_v3 = vadd.f32 %v733_v2, %v3642_v56  ;;  %v967_v27 = vmul.f32 %v903_v20, %v3662_v10  ;;  %v994_v2 = vmul.f32 %v930_v52, %v3645_v58  ;;  %v782_v11 = vpop.f32.mrf.mxu3  ;;  %2995 = vtanh.f32 %v1155_v62  ;;  %v2845_v20 = vld [vmem:[#allocation11 + $0xb8] sm:$0xff] }
  0xf4   : > { %v716_v6 = vpop.f32.mrf.mxu0  ;;  %2118 = vmatpush.bf16.msra.mxu0 %v2845_v20  ;;  %v3732_v25 = vadd.f32 %v782_v11, %v3648_v1  ;;  %v1123_v42 = vadd.f32 %v1059_v24, %v3690_v43 }
  0xf5   : > { %2025 = vmatpush.bf16.msra.mxu2 %v2824_v21  ;;  %v1031_v37 = vmul.f32 0.044715, %v967_v27  ;;  %v3693_v44 = vadd.f32 %v716_v6, %v3642_v56  ;;  %v2863_v6 = vld [vmem:[#allocation7 + $0x8] sm:$0xff]  ;;  %v1058_v21 = vmul.f32 0.044715, %v994_v2  ;;  %v934_v27 = vmul.f32 %v3651_v3, %v3651_v3 }
  0xf6   : > { %v765_v9 = vpop.f32.mrf.mxu1  ;;  %1781 = vmatpush.bf16.msrb.mxu1 %v2863_v6  ;;  %v935_v46 = vmul.f32 %v3732_v25, %v3732_v25 }
  0xf7   : > { %833 = vmatmul.bf16.gmra.mxu2 %v3609_v16  ;;  %1671 = vmatmul.bf16.gmra.mxu0 %v3609_v16  ;;  %v3697_v48 = vadd.f32 %v765_v9, %v3648_v1  ;;  %v1095_v49 = vadd.f32 %v1031_v37, %v3662_v10  ;;  %v906_v61 = vmul.f32 %v3693_v44, %v3693_v44 }
  0xf8   : > { %882 = vmatmul.bf16.gmra.mxu3 %v3609_v16  ;;  %v902_v16 = vmul.f32 %v3665_v13, %v3665_v13  ;;  %v1122_v32 = vadd.f32 %v1058_v21, %v3645_v58  ;;  %v999_v15 = vmul.f32 %v935_v46, %v3732_v25 }
  0xf9   : > { %2026 = vmatpush.bf16.msra.mxu2 %v2823_v28  ;;  %v907_v50 = vmul.f32 %v3697_v48, %v3697_v48 }
  0xfa   : > { %v736_v17 = vpop.f32.mrf.mxu2  ;;  %v966_v30 = vmul.f32 %v902_v16, %v3665_v13  ;;  %v2862_v16 = vld [vmem:[#allocation7] sm:$0xff] }
  0xfb   : > { %v3673_v19 = vadd.f32 %v736_v17, %v3642_v56  ;;  %v970_v17 = vmul.f32 %v906_v61, %v3693_v44  ;;  %v971_v18 = vmul.f32 %v907_v50, %v3697_v48  ;;  %1782 = vmatpush.bf16.msrb.mxu1 %v2862_v16  ;;  %v785_v59 = vpop.f32.mrf.mxu3 }
  0xfc   : > { %v718_v23 = vpop.f32.mrf.mxu0  ;;  %v1030_v40 = vmul.f32 0.044715, %v966_v30  ;;  %v2844_v30 = vld [vmem:[#allocation11 + $0xb0] sm:$0xff] }
  0xfd   : > { %2027 = vmatpush.bf16.msra.mxu2 %v2822_v38  ;;  %v3709_v57 = vadd.f32 %v718_v23, %v3642_v56  ;;  %v1034_v26 = vmul.f32 0.044715, %v970_v17  ;;  %v1035_v29 = vmul.f32 0.044715, %v971_v18  ;;  %2119 = vmatpush.bf16.msra.mxu0 %v2844_v30  ;;  %v938_v50 = vmul.f32 %v3673_v19, %v3673_v19 }
  0xfe   : > { %v767_v31 = vpop.f32.mrf.mxu1  ;;  %v1094_v55 = vadd.f32 %v1030_v40, %v3665_v13 }
  0xff   : > { %v3705_v53 = vadd.f32 %v767_v31, %v3648_v1  ;;  %v910_v12 = vmul.f32 %v3709_v57, %v3709_v57  ;;  %v2994_v31 = vpop.eup %2993  ;;  %v1098_v52 = vadd.f32 %v1034_v26, %v3693_v44  ;;  %v1099_v62 = vadd.f32 %v1035_v29, %v3697_v48 }
 0x100   : > { %v1158_v9 = vmul.f32 0.7978846, %v1094_v55  ;;  %v2996_v35 = vpop.eup %2995  ;;  %v998_v55 = vmul.f32 %v934_v27, %v3651_v3 }
 0x101   : > { %v911_v5 = vmul.f32 %v3705_v53, %v3705_v53  ;;  %v974_v23 = vmul.f32 %v910_v12, %v3709_v57  ;;  %v1162_v11 = vmul.f32 0.7978846, %v1098_v52  ;;  %v3769_v12 = vadd.f32 %v785_v59, %v3648_v1 }
 0x102   : > { %v738_v34 = vpop.f32.mrf.mxu2  ;;  %v1163_v20 = vmul.f32 0.7978846, %v1099_v62  ;;  %v1062_v24 = vmul.f32 0.044715, %v998_v55 }
 0x103   : > { %v3684_v36 = vadd.f32 %v738_v34, %v3642_v56  ;;  %v975_v22 = vmul.f32 %v911_v5, %v3705_v53  ;;  %v1038_v37 = vmul.f32 0.044715, %v974_v23  ;;  %v1283_v5 = vadd.f32 1.0, %v2996_v35  ;;  %v787_v55 = vpop.f32.mrf.mxu3 }
 0x104   : > { %v3686_v41 = vpop.f32.mrf.mxu0 }
 0x105   : > { %v1039_v34 = vmul.f32 0.044715, %v975_v22  ;;  %v3752_v60 = vadd.f32 %v3686_v41, %v3642_v56  ;;  %v1282_v41 = vadd.f32 1.0, %v2994_v31  ;;  %v1347_v27 = vmul.f32 0.5, %v1283_v5 }
 0x106   : > { %v770_v0 = vpop.f32.mrf.mxu1  ;;  %v939_v31 = vmul.f32 %v3769_v12, %v3769_v12 }
 0x107   : > { %838 = vmatmul.bf16.gmra.mxu2 %v3617_v45  ;;  %1676 = vmatmul.bf16.gmra.mxu0 %v3617_v45  ;;  %v914_v17 = vmul.f32 %v3752_v60, %v3752_v60  ;;  %v1411_v59 = vmul.f32 %v1347_v27, %v3657_v8  ;;  %v3814_v27 = vadd.f32 %v787_v55, %v3648_v1 }
 0x108   : > { %887 = vmatmul.bf16.gmra.mxu3 %v3617_v45  ;;  %v1159_v45 = vmul.f32 0.7978846, %v1095_v49  ;;  %v3747_v49 = vadd.f32 %v770_v0, %v3648_v1  ;;  %v1103_v0 = vadd.f32 %v1039_v34, %v3705_v53  ;;  %v1346_v34 = vmul.f32 0.5, %v1282_v41 }
 0x109   : > { %v978_v35 = vmul.f32 %v914_v17, %v3752_v60  ;;  %v1003_v41 = vmul.f32 %v939_v31, %v3769_v12 }
 0x10a   : > { %v741_v63 = vpop.f32.mrf.mxu2  ;;  %2997 = vtanh.f32 %v1159_v45  ;;  %v1102_v45 = vadd.f32 %v1038_v37, %v3709_v57  ;;  %v1167_v16 = vmul.f32 0.7978846, %v1103_v0  ;;  %v1126_v0 = vadd.f32 %v1062_v24, %v3651_v3 }
 0x10b   : > { %v3720_v4 = vadd.f32 %v741_v63, %v3642_v56  ;;  %2999 = vtanh.f32 %v1158_v9  ;;  %v1186_v63 = vmul.f32 0.7978846, %v1122_v32  ;;  %v1042_v5 = vmul.f32 0.044715, %v978_v35 }
 0x10c   : > { %v723_v14 = vpop.f32.mrf.mxu0  ;;  %v1166_v26 = vmul.f32 0.7978846, %v1102_v45  ;;  %3001 = vtanh.f32 %v1162_v11  ;;  %v2843_v11 = vld [vmem:[#allocation11 + $0xa8] sm:$0xff] }
 0x10d   : > { %v3755_v61 = vadd.f32 %v723_v14, %v3642_v56  ;;  %v915_v14 = vmul.f32 %v3747_v49, %v3747_v49  ;;  %3003 = vtanh.f32 %v1163_v20  ;;  %2120 = vmatpush.bf16.msra.mxu0 %v2843_v11 }
 0x10e   : > { %v772_v39 = vpop.f32.mrf.mxu1  ;;  %3005 = vtanh.f32 %v1167_v16  ;;  %v3808_v16 = vmul.f32 0.7978846, %v1126_v0 }
 0x10f   : > { %v3764_v2 = vadd.f32 %v772_v39, %v3648_v1  ;;  %v918_v18 = vmul.f32 %v3755_v61, %v3755_v61  ;;  %v979_v32 = vmul.f32 %v915_v14, %v3747_v49  ;;  %3007 = vtanh.f32 %v1166_v26 }
 0x110   : > { %v2998_v40 = vpop.eup %2997  ;;  %3009 = vtanh.f32 %v1186_v63 }
 0x111   : > { %v3000_v54 = vpop.eup %2999  ;;  %v1287_v6 = vadd.f32 1.0, %v2998_v40  ;;  %v919_v23 = vmul.f32 %v3764_v2, %v3764_v2  ;;  %v982_v37 = vmul.f32 %v918_v18, %v3755_v61  ;;  %v1187_v40 = vmul.f32 0.7978846, %v1123_v42 }
 0x112   : > { %v743_v28 = vpop.f32.mrf.mxu2  ;;  %v1286_v9 = vadd.f32 1.0, %v3000_v54  ;;  %v1063_v54 = vmul.f32 0.044715, %v999_v15  ;;  %v1043_v45 = vmul.f32 0.044715, %v979_v32  ;;  %v1410_v42 = vmul.f32 %v1346_v34, %v3654_v7  ;;  %v3002_v14 = vpop.eup %3001  ;;  %v2842_v32 = vld [vmem:[#allocation11 + $0xa0] sm:$0xff] }
 0x113   : > { %v3738_v33 = vadd.f32 %v743_v28, %v3642_v56  ;;  %v1351_v28 = vmul.f32 0.5, %v1287_v6  ;;  %v983_v52 = vmul.f32 %v919_v23, %v3764_v2  ;;  %v1046_v6 = vmul.f32 0.044715, %v982_v37  ;;  %v3004_v17 = vpop.eup %3003  ;;  %v3828_v37 = vld [vmem:[%s4443_s2] ss:$0 sm:$0xff]  ;;  %2121 = vmatpush.bf16.msra.mxu0 %v2842_v32 }
 0x114   : > { %v3740_v38 = vpop.f32.mrf.mxu0  ;;  %v1350_v30 = vmul.f32 0.5, %v1286_v9  ;;  %3011 = vtanh.f32 %v1187_v40  ;;  %v3803_v18 = vadd.f32 %v1063_v54, %v3732_v25  ;;  %v3810_v23 = vmul.f32 0.044715, %v1003_v41 }
 0x115   : > { %v1415_v62 = vmul.f32 %v1351_v28, %v3662_v10  ;;  %v942_v10 = vmul.f32 %v3684_v36, %v3684_v36  ;;  %v1047_v15 = vmul.f32 0.044715, %v983_v52  ;;  %v1107_v24 = vadd.f32 %v1043_v45, %v3747_v49 }
 0x116   : > { %v775_v39 = vpop.f32.mrf.mxu1  ;;  %v1106_v28 = vadd.f32 %v1042_v5, %v3752_v60  ;;  %v3820_v31 = vadd.f32 %v3740_v38, %v3642_v56  ;;  %v1291_v54 = vadd.f32 1.0, %v3004_v17 }
 0x117   : > { %843 = vmatmul.bf16.gmra.mxu2 %v3623_v47  ;;  %1681 = vmatmul.bf16.gmra.mxu0 %v3623_v47  ;;  %v1475_v7 = vpack.c.bf16 %v1415_v62, %v1411_v59  ;;  %v3806_v20 = vadd.f32 %v775_v39, %v3648_v1  ;;  %v1006_v35 = vmul.f32 %v942_v10, %v3684_v36  ;;  %v3831_v39 = vperm.slane %v3636_v51, 2 }
 0x118   : > { %892 = vmatmul.bf16.gmra.mxu3 %v3623_v47  ;;  %v1002_v47 = vmul.f32 %v938_v50, %v3673_v19  ;;  %v1414_v50 = vmul.f32 %v1350_v30, %v3665_v13  ;;  %v1110_v30 = vadd.f32 %v1046_v6, %v3755_v61  ;;  %v1111_v40 = vadd.f32 %v1047_v15, %v3764_v2 }
 0x119   : > { %v923_v52 = vmul.f32 %v3806_v20, %v3806_v20  ;;  %v1171_v62 = vmul.f32 0.7978846, %v1107_v24  ;;  %v1170_v45 = vmul.f32 0.7978846, %v1106_v28  ;;  %v922_v5 = vmul.f32 %v3820_v31, %v3820_v31 }
 0x11a   : > { %v746_v21 = vpop.f32.mrf.mxu2  ;;  %v1066_v46 = vmul.f32 0.044715, %v1002_v47  ;;  %v1474_v47 = vpack.c.bf16 %v1414_v50, %v1410_v42  ;;  %v1290_v50 = vadd.f32 1.0, %v3002_v14  ;;  %v1174_v42 = vmul.f32 0.7978846, %v1110_v30 }
 0x11b   : > { %v3780_v22 = vadd.f32 %v746_v21, %v3642_v56  ;;  %v3006_v21 = vpop.eup %3005  ;;  %3013 = vtanh.f32 %v1171_v62  ;;  %v986_v30 = vmul.f32 %v922_v5, %v3820_v31  ;;  %v2852_v5 = vld [vmem:[#allocation11 + $0xf0] sm:$0xff] }
 0x11c   : > { %v728_v29 = vpop.f32.mrf.mxu0  ;;  %v1130_v8 = vadd.f32 %v1066_v46, %v3673_v19  ;;  %v3008_v26 = vpop.eup %3007  ;;  %v1295_v55 = vadd.f32 1.0, %v3006_v21  ;;  %v1355_v21 = vmul.f32 0.5, %v1291_v54  ;;  %v1354_v32 = vmul.f32 0.5, %v1290_v50  ;;  %v2839_v50 = vld [vmem:[#allocation11 + $0x88] sm:$0xff] }
 0x11d   : > { %v3834_v46 = vpop.eup %3009  ;;  %v3837_v38 = vadd.f32 %v728_v29, %v3642_v56  ;;  %v1294_v0 = vadd.f32 1.0, %v3008_v26  ;;  %v3848_v29 = vpop.f32.mrf.mxu3  ;;  %v2853_v26 = vld [vmem:[#allocation11 + $0xf8] sm:$0xff]  ;;  %3015 = vtanh.f32 %v1174_v42 }
 0x11e   : > { %v3822_v34 = vmul.f32 0.7978846, %v1130_v8  ;;  %v777_v59 = vpop.f32.mrf.mxu1  ;;  %v3844_v41 = vpop.eup %3011  ;;  %v1175_v8 = vmul.f32 0.7978846, %v1111_v40  ;;  %2167 = vmatpush.bf16.msra.mxu1 %v2853_v26 }
 0x11f   : > { %v3842_v51 = vadd.f32 %v777_v59, %v3648_v1  ;;  %v926_v15 = vmul.f32 %v3837_v38, %v3837_v38  ;;  %v1358_v28 = vmul.f32 0.5, %v1294_v0  ;;  %v2840_v59 = vld [vmem:[#allocation11 + $0x90] sm:$0xff] }
 0x120   : > { %3017 = vtanh.f32 %v1175_v8 }
 0x121   : > { %v927_v10 = vmul.f32 %v3842_v51, %v3842_v51  ;;  %3019 = vtanh.f32 %v1170_v45  ;;  %v1422_v42 = vmul.f32 %v1358_v28, %v3709_v57  ;;  %v1418_v45 = vmul.f32 %v1354_v32, %v3693_v44 }
 0x122   : > { %v748_v9 = vpop.f32.mrf.mxu2  ;;  %3021 = vtanh.f32 %v3808_v16  ;;  %2168 = vmatpush.bf16.msra.mxu1 %v2852_v5 }
 0x123   : > { %v3800_v13 = vadd.f32 %v748_v9, %v3642_v56  ;;  %v946_v56 = vmul.f32 %v3720_v4, %v3720_v4  ;;  %v2841_v9 = vld [vmem:[#allocation11 + $0x98] sm:$0xff]  ;;  %v991_v40 = vmul.f32 %v927_v10, %v3842_v51  ;;  %v1478_v32 = vpack.c.bf16 %v1422_v42, %v1418_v45 }
 0x124   : > { %v1647_v63 = vpop.f32.mrf.mxu0  ;;  %2122 = vmatpush.bf16.msra.mxu0 %v2841_v9  ;;  %v1419_v9 = vmul.f32 %v1355_v21, %v3697_v48  ;;  %v1050_v48 = vmul.f32 0.044715, %v986_v30  ;;  %3023 = vtanh.f32 %v3822_v34  ;;  %v1314_v45 = vadd.f32 1.0, %v3834_v46 }
 0x125   : > { %v1648_v11 = vadd.f32 %v3828_v37, %v1647_v63  ;;  %v1010_v57 = vmul.f32 %v946_v56, %v3720_v4  ;;  %v3890_v56 = vadd.f32 %v3810_v23, %v3769_v12 }
 0x127   : > { %2028 = vmatmul.bf16.vlgmr.msra.gmra.mxu2 %v1474_v47  ;;  %v1359_v47 = vmul.f32 0.5, %v1295_v55  ;;  %v990_v55 = vmul.f32 %v926_v15, %v3837_v38  ;;  %v3014_v15 = vpop.eup %3013 }
 0x128   : > { %2077 = vmatmul.bf16.vlgmr.msra.gmra.mxu3 %v1475_v7  ;;  %v987_v7 = vmul.f32 %v923_v52, %v3806_v20  ;;  %2123 = vmatpush.bf16.msra.mxu0 %v2840_v59  ;;  %v3016_v21 = vpop.eup %3015 }
 0x129   : > { %v1423_v0 = vmul.f32 %v1359_v47, %v3705_v53  ;;  %v1054_v47 = vmul.f32 0.044715, %v990_v55  ;;  %v3018_v30 = vpop.eup %3017 }
 0x12a   : > { %v809_v6 = vpop.f32.mrf.mxu2  ;;  %v1051_v62 = vmul.f32 0.044715, %v987_v7  ;;  %v3020_v55 = vpop.eup %3019 }
 0x12b   : > { %v3854_v14 = vadd.f32 %v809_v6, %v3831_v39  ;;  %v1687_v6 = vmax.f32 %v1648_v11, 0.0  ;;  %v1070_v11 = vmul.f32 0.044715, %v1006_v35  ;;  %v3880_v35 = vpop.f32.mrf.mxu3  ;;  %v1479_v16 = vpack.c.bf16 %v1423_v0, %v1419_v9  ;;  %v3022_v34 = vpop.eup %3021 }
 0x12c   : > { %v1649_v17 = vpop.f32.mrf.mxu0  ;;  %v1115_v26 = vadd.f32 %v1051_v62, %v3806_v20  ;;  %2124 = vmatpush.bf16.msra.mxu0 %v2839_v50  ;;  %v1114_v9 = vadd.f32 %v1050_v48, %v3820_v31  ;;  %v1118_v5 = vadd.f32 %v1054_v47, %v3837_v38  ;;  %v1299_v50 = vadd.f32 1.0, %v3014_v15 }
 0x12d   : > { %v900_v63 = vmul.f32 %v3854_v14, %v3854_v14  ;;  %v1650_v24 = vadd.f32 %v3828_v37, %v1649_v17  ;;  %v3895_v62 = vadd.f32 %v1070_v11, %v3684_v36  ;;  %v1302_v11 = vadd.f32 1.0, %v3016_v21 }
 0x12e   : > { %v1179_v23 = vmul.f32 0.7978846, %v1115_v26  ;;  %v1318_v15 = vadd.f32 1.0, %v3022_v34  ;;  %v1363_v21 = vmul.f32 0.5, %v1299_v50  ;;  %v1378_v34 = vmul.f32 0.5, %v1314_v45 }
 0x12f   : > { %v964_v52 = vmul.f32 %v900_v63, %v3854_v14  ;;  %v1688_v54 = vmax.f32 %v1650_v24, 0.0  ;;  %v943_v63 = vmul.f32 %v3814_v27, %v3814_v27  ;;  %v1055_v24 = vmul.f32 0.044715, %v991_v40 }
 0x130   : > { %v950_v40 = vmul.f32 %v3738_v33, %v3738_v33  ;;  %v1382_v50 = vmul.f32 0.5, %v1318_v15  ;;  %v3920_v15 = vmul.f32 %v1378_v34, %v3645_v58 }
 0x131   : > { %v1028_v10 = vmul.f32 0.044715, %v964_v52  ;;  %v1703_v17 = vpack.c.bf16 %v1688_v54, %v1687_v6  ;;  %v1007_v6 = vmul.f32 %v943_v63, %v3814_v27  ;;  %v1119_v52 = vadd.f32 %v1055_v24, %v3842_v51  ;;  %v2838_v54 = vld [vmem:[#allocation11 + $0x80] sm:$0xff] }
 0x132   : > { %v811_v8 = vpop.f32.mrf.mxu2  ;;  %2125 = vmatpush.bf16.msra.mxu0 %v2838_v54  ;;  %v1014_v42 = vmul.f32 %v950_v40, %v3738_v33 }
 0x133   : > { %v1092_v53 = vadd.f32 %v1028_v10, %v3854_v14  ;;  %v3876_v7 = vadd.f32 %v811_v8, %v3831_v39  ;;  %1783 = vmatmul.bf16.vlgmr.msrb.gmra.mxu1 %v1703_v17  ;;  %v1303_v10 = vadd.f32 1.0, %v3018_v30  ;;  %v1074_v17 = vmul.f32 0.044715, %v1010_v57  ;;  %v3912_v54 = vpop.f32.mrf.mxu3 }
 0x134   : > { %v1652_v28 = vpop.f32.mrf.mxu0  ;;  %v1183_v48 = vmul.f32 0.7978846, %v1119_v52  ;;  %v1182_v57 = vmul.f32 0.7978846, %v1118_v5  ;;  %v1366_v52 = vmul.f32 0.5, %v1302_v11 }
 0x135   : > { %v1156_v59 = vmul.f32 0.7978846, %v1092_v53  ;;  %v904_v44 = vmul.f32 %v3876_v7, %v3876_v7  ;;  %v1653_v8 = vadd.f32 %v3828_v37, %v1652_v28  ;;  %v1298_v53 = vadd.f32 1.0, %v3020_v55 }
 0x136   : > { %v1367_v40 = vmul.f32 0.5, %v1303_v10  ;;  %v1138_v45 = vadd.f32 %v1074_v17, %v3720_v4  ;;  %v1198_v17 = vmul.f32 0.7978846, %v3895_v62  ;;  %v3946_v62 = vadd.f32 %v3848_v29, %v3648_v1 }
 0x137   : > { %3025 = vtanh.f32 %v1156_v59  ;;  %v968_v0 = vmul.f32 %v904_v44, %v3876_v7  ;;  %2033 = vmatmul.bf16.gmra.mxu2 %v1478_v32  ;;  %v1178_v59 = vmul.f32 0.7978846, %v1114_v9  ;;  %v1689_v55 = vmax.f32 %v1653_v8, 0.0 }
 0x138   : > { %2082 = vmatmul.bf16.gmra.mxu3 %v1479_v16  ;;  %v3907_v16 = vpop.eup %3023  ;;  %3027 = vtanh.f32 %v1179_v23  ;;  %v1362_v9 = vmul.f32 0.5, %v1298_v53  ;;  %v1430_v8 = vmul.f32 %v1366_v52, %v3755_v61  ;;  %v3939_v52 = vmul.f32 0.7978846, %v3890_v56 }
 0x139   : > { %v1032_v63 = vmul.f32 0.044715, %v968_v0  ;;  %v2851_v0 = vld [vmem:[#allocation11 + $0xe8] sm:$0xff]  ;;  %3029 = vtanh.f32 %v1183_v48  ;;  %v1071_v48 = vmul.f32 0.044715, %v1007_v6  ;;  %v954_v29 = vmul.f32 %v3780_v22, %v3780_v22 }
 0x13a   : > { %v814_v24 = vpop.f32.mrf.mxu2  ;;  %2169 = vmatpush.bf16.msra.mxu1 %v2851_v0  ;;  %v3931_v6 = vmul.f32 0.7978846, %v3803_v18  ;;  %v1202_v0 = vmul.f32 0.7978846, %v1138_v45 }
 0x13b   : > { %v1096_v47 = vadd.f32 %v1032_v63, %v3876_v7  ;;  %v3905_v26 = vadd.f32 %v814_v24, %v3831_v39  ;;  %v1427_v63 = vmul.f32 %v1363_v21, %v3747_v49  ;;  %v1431_v24 = vmul.f32 %v1367_v40, %v3764_v2 }
 0x13c   : > { %v1654_v30 = vpop.f32.mrf.mxu0  ;;  %v3942_v18 = vadd.f32 %v1071_v48, %v3814_v27 }
 0x13d   : > { %v3026_v28 = vpop.eup %3025  ;;  %v1160_v44 = vmul.f32 0.7978846, %v1096_v47  ;;  %v908_v32 = vmul.f32 %v3905_v26, %v3905_v26  ;;  %v1655_v46 = vadd.f32 %v3828_v37, %v1654_v30  ;;  %v1078_v30 = vmul.f32 0.044715, %v1014_v42 }
 0x13e   : > { %v1284_v10 = vadd.f32 1.0, %v3026_v28  ;;  %v3028_v53 = vpop.eup %3027  ;;  %v1483_v21 = vpack.c.bf16 %v1431_v24, %v1427_v63 }
 0x13f   : > { %3031 = vtanh.f32 %v1160_v44  ;;  %v972_v5 = vmul.f32 %v908_v32, %v3905_v26  ;;  %v1690_v23 = vmax.f32 %v1655_v46, 0.0  ;;  %v3030_v61 = vpop.eup %3029  ;;  %v1142_v34 = vadd.f32 %v1078_v30, %v3738_v33 }
 0x140   : > { %3033 = vtanh.f32 %v1182_v57  ;;  %v3928_v57 = vmul.f32 %v1382_v50, %v3651_v3  ;;  %v1348_v42 = vmul.f32 0.5, %v1284_v10  ;;  %v1307_v10 = vadd.f32 1.0, %v3028_v53 }
 0x141   : > { %3035 = vtanh.f32 %v1178_v59  ;;  %v1036_v11 = vmul.f32 0.044715, %v972_v5  ;;  %v1704_v47 = vpack.c.bf16 %v1690_v23, %v1689_v55  ;;  %v1426_v59 = vmul.f32 %v1362_v9, %v3752_v60  ;;  %v3950_v23 = vpop.f32.mrf.mxu3 }
 0x142   : > { %v816_v44 = vpop.f32.mrf.mxu2  ;;  %v1490_v60 = vpack.c.bf16 %v3928_v57, %v3920_v15  ;;  %v1412_v56 = vmul.f32 %v1348_v42, %v3854_v14  ;;  %v1311_v63 = vadd.f32 1.0, %v3030_v61  ;;  %v1322_v30 = vadd.f32 1.0, %v3907_v16 }
 0x143   : > { %v1100_v49 = vadd.f32 %v1036_v11, %v3905_v26  ;;  %v3924_v2 = vadd.f32 %v816_v44, %v3831_v39  ;;  %1788 = vmatmul.bf16.gmra.mxu1 %v1704_v47  ;;  %v1482_v46 = vpack.c.bf16 %v1430_v8, %v1426_v59  ;;  %v958_v47 = vmul.f32 %v3800_v13, %v3800_v13 }
 0x144   : > { %v1657_v58 = vpop.f32.mrf.mxu0  ;;  %v1375_v42 = vmul.f32 0.5, %v1311_v63 }
 0x145   : > { %v3032_v40 = vpop.eup %3031  ;;  %v1164_v28 = vmul.f32 0.7978846, %v1100_v49  ;;  %v912_v32 = vmul.f32 %v3924_v2, %v3924_v2  ;;  %v1658_v53 = vadd.f32 %v3828_v37, %v1657_v58  ;;  %v1206_v49 = vmul.f32 0.7978846, %v1142_v34 }
 0x146   : > { %v3034_v3 = vpop.eup %3033  ;;  %v1288_v55 = vadd.f32 1.0, %v3032_v40  ;;  %v1022_v58 = vmul.f32 %v958_v47, %v3800_v13 }
 0x147   : > { %v3036_v9 = vpop.eup %3035  ;;  %3037 = vtanh.f32 %v1164_v28  ;;  %v976_v5 = vmul.f32 %v912_v32, %v3924_v2  ;;  %2038 = vmatmul.bf16.gmra.mxu2 %v1482_v46  ;;  %v1310_v11 = vadd.f32 1.0, %v3034_v3  ;;  %v1018_v32 = vmul.f32 %v954_v29, %v3780_v22  ;;  %v2850_v3 = vld [vmem:[#allocation11 + $0xe0] sm:$0xff] }
 0x148   : > { %v1352_v50 = vmul.f32 0.5, %v1288_v55  ;;  %2087 = vmatmul.bf16.gmra.mxu3 %v1483_v21  ;;  %3039 = vtanh.f32 %v1198_v17  ;;  %v1306_v45 = vadd.f32 1.0, %v3036_v9  ;;  %v1371_v17 = vmul.f32 0.5, %v1307_v10  ;;  %2170 = vmatpush.bf16.msra.mxu1 %v2850_v3 }
 0x149   : > { %v1040_v24 = vmul.f32 0.044715, %v976_v5  ;;  %3041 = vtanh.f32 %v1202_v0  ;;  %v1374_v28 = vmul.f32 0.5, %v1310_v11  ;;  %v1386_v55 = vmul.f32 0.5, %v1322_v30 }
 0x14a   : > { %v1416_v8 = vmul.f32 %v1352_v50, %v3876_v7  ;;  %v819_v48 = vpop.f32.mrf.mxu2  ;;  %v1370_v46 = vmul.f32 0.5, %v1306_v45  ;;  %v1691_v0 = vmax.f32 %v1658_v53, 0.0  ;;  %v1439_v50 = vmul.f32 %v1375_v42, %v3842_v51 }
 0x14b   : > { %v1104_v14 = vadd.f32 %v1040_v24, %v3924_v2  ;;  %v3962_v44 = vadd.f32 %v819_v48, %v3831_v39  ;;  %v1438_v47 = vmul.f32 %v1374_v28, %v3837_v38  ;;  %v3978_v48 = vadd.f32 %v3880_v35, %v3648_v1 }
 0x14c   : > { %v1476_v59 = vpack.c.bf16 %v1416_v8, %v1412_v56  ;;  %v1659_v61 = vpop.f32.mrf.mxu0  ;;  %v1435_v56 = vmul.f32 %v1371_v17, %v3806_v20  ;;  %v947_v8 = vmul.f32 %v3946_v62, %v3946_v62  ;;  %v3980_v20 = vpop.f32.mrf.mxu3  ;;  %v3983_v30 = vmul.f32 %v1386_v55, %v3673_v19 }
 0x14d   : > { %v3038_v21 = vpop.eup %3037  ;;  %v1168_v40 = vmul.f32 0.7978846, %v1104_v14  ;;  %v916_v7 = vmul.f32 %v3962_v44, %v3962_v44  ;;  %v1660_v16 = vadd.f32 %v3828_v37, %v1659_v61  ;;  %v1082_v53 = vmul.f32 0.044715, %v1018_v32 }
 0x14e   : > { %2126 = vmatmul.bf16.vlgmr.msra.gmra.mxu0 %v1476_v59  ;;  %v3040_v9 = vpop.eup %3039  ;;  %v1292_v10 = vadd.f32 1.0, %v3038_v21  ;;  %v1487_v35 = vpack.c.bf16 %v1439_v50, %v1435_v56  ;;  %v1086_v21 = vmul.f32 0.044715, %v1022_v58  ;;  %v1199_v28 = vmul.f32 0.7978846, %v3942_v18 }
 0x14f   : > { %v980_v34 = vmul.f32 %v916_v7, %v3962_v44  ;;  %v1692_v5 = vmax.f32 %v1660_v16, 0.0  ;;  %3043 = vtanh.f32 %v1168_v40  ;;  %v1326_v63 = vadd.f32 1.0, %v3040_v9  ;;  %v3042_v29 = vpop.eup %3041 }
 0x150   : > { %3045 = vtanh.f32 %v3931_v6  ;;  %v1434_v6 = vmul.f32 %v1370_v46, %v3820_v31  ;;  %v1356_v61 = vmul.f32 0.5, %v1292_v10  ;;  %v951_v32 = vmul.f32 %v3978_v48, %v3978_v48 }
 0x151   : > { %v1044_v24 = vmul.f32 0.044715, %v980_v34  ;;  %v1705_v11 = vpack.c.bf16 %v1692_v5, %v1691_v0  ;;  %v1390_v45 = vmul.f32 0.5, %v1326_v63  ;;  %3047 = vtanh.f32 %v1206_v49 }
 0x152   : > { %v821_v51 = vpop.f32.mrf.mxu2  ;;  %v1486_v7 = vpack.c.bf16 %v1438_v47, %v1434_v6  ;;  %3049 = vtanh.f32 %v3939_v52  ;;  %v1146_v58 = vadd.f32 %v1082_v53, %v3780_v22  ;;  %v1420_v52 = vmul.f32 %v1356_v61, %v3905_v26 }
 0x153   : > { %v1108_v14 = vadd.f32 %v1044_v24, %v3962_v44  ;;  %v3987_v38 = vadd.f32 %v821_v51, %v3831_v39  ;;  %1793 = vmatmul.bf16.gmra.mxu1 %v1705_v11  ;;  %v3991_v17 = vmul.f32 %v1390_v45, %v3684_v36  ;;  %v1011_v55 = vmul.f32 %v947_v8, %v3946_v62 }
 0x154   : > { %v1662_v59 = vpop.f32.mrf.mxu0  ;;  %v1150_v9 = vadd.f32 %v1086_v21, %v3800_v13  ;;  %v1330_v18 = vadd.f32 1.0, %v3042_v29  ;;  %v1315_v56 = vadd.f32 1.0, %v3844_v41  ;;  %v1015_v8 = vmul.f32 %v951_v32, %v3978_v48  ;;  %v4016_v51 = vpop.f32.mrf.mxu3 }
 0x155   : > { %v3044_v42 = vpop.eup %3043  ;;  %v1172_v19 = vmul.f32 0.7978846, %v1108_v14  ;;  %v920_v40 = vmul.f32 %v3987_v38, %v3987_v38  ;;  %v1494_v31 = vpack.c.bf16 %v3991_v17, %v3983_v30  ;;  %v1663_v24 = vadd.f32 %v3828_v37, %v1662_v59 }
 0x156   : > { %v1296_v16 = vadd.f32 1.0, %v3044_v42  ;;  %v3046_v49 = vpop.eup %3045  ;;  %v1394_v11 = vmul.f32 0.5, %v1330_v18  ;;  %v1210_v29 = vmul.f32 0.7978846, %v1146_v58  ;;  %v1214_v61 = vmul.f32 0.7978846, %v1150_v9 }
 0x157   : > { %3051 = vtanh.f32 %v1172_v19  ;;  %v984_v36 = vmul.f32 %v920_v40, %v3987_v38  ;;  %2043 = vmatmul.bf16.gmra.mxu2 %v1486_v7  ;;  %v3048_v3 = vpop.eup %3047  ;;  %v1319_v50 = vadd.f32 1.0, %v3046_v49  ;;  %v1379_v42 = vmul.f32 0.5, %v1315_v56 }
 0x158   : > { %2092 = vmatmul.bf16.gmra.mxu3 %v1487_v35  ;;  %v1360_v46 = vmul.f32 0.5, %v1296_v16  ;;  %v1334_v10 = vadd.f32 1.0, %v3048_v3  ;;  %v4013_v47 = vpop.eup %3049  ;;  %v4022_v35 = vmul.f32 %v1394_v11, %v3720_v4  ;;  %v1693_v40 = vmax.f32 %v1663_v24, 0.0 }
 0x159   : > { %v1048_v0 = vmul.f32 0.044715, %v984_v36  ;;  %v1383_v21 = vmul.f32 0.5, %v1319_v50  ;;  %v2849_v36 = vld [vmem:[#allocation11 + $0xd8] sm:$0xff]  ;;  %v1075_v4 = vmul.f32 0.044715, %v1011_v55  ;;  %v1443_v3 = vmul.f32 %v1379_v42, %v3690_v43 }
 0x15a   : > { %v824_v34 = vpop.f32.mrf.mxu2  ;;  %v1424_v5 = vmul.f32 %v1360_v46, %v3924_v2  ;;  %v1398_v41 = vmul.f32 0.5, %v1334_v10  ;;  %2171 = vmatpush.bf16.msra.mxu1 %v2849_v36  ;;  %v1079_v9 = vmul.f32 0.044715, %v1015_v8 }
 0x15b   : > { %v1112_v63 = vadd.f32 %v1048_v0, %v3987_v38  ;;  %v4011_v26 = vadd.f32 %v824_v34, %v3831_v39  ;;  %v1139_v56 = vadd.f32 %v1075_v4, %v3946_v62 }
 0x15c   : > { %v1664_v2 = vpop.f32.mrf.mxu0  ;;  %v1480_v45 = vpack.c.bf16 %v1424_v5, %v1420_v52  ;;  %v4025_v19 = vmul.f32 %v1398_v41, %v3738_v33  ;;  %v1447_v33 = vmul.f32 %v1383_v21, %v3732_v25  ;;  %v4039_v25 = vpop.f32.mrf.mxu3  ;;  %v1143_v11 = vadd.f32 %v1079_v9, %v3978_v48 }
 0x15d   : > { %v3052_v14 = vpop.eup %3051  ;;  %v1176_v6 = vmul.f32 0.7978846, %v1112_v63  ;;  %v924_v53 = vmul.f32 %v4011_v26, %v4011_v26  ;;  %v1665_v59 = vadd.f32 %v3828_v37, %v1664_v2  ;;  %v4048_v2 = vadd.f32 %v3912_v54, %v3648_v1 }
 0x15e   : > { %2131 = vmatmul.bf16.gmra.mxu0 %v1480_v45  ;;  %v1300_v49 = vadd.f32 1.0, %v3052_v14  ;;  %v1498_v32 = vpack.c.bf16 %v4025_v19, %v4022_v35  ;;  %v1491_v10 = vpack.c.bf16 %v1447_v33, %v1443_v3  ;;  %v4052_v45 = vadd.f32 %v3950_v23, %v3648_v1 }
 0x15f   : > { %v988_v7 = vmul.f32 %v924_v53, %v4011_v26  ;;  %v1694_v16 = vmax.f32 %v1665_v59, 0.0  ;;  %3053 = vtanh.f32 %v1176_v6  ;;  %v1203_v6 = vmul.f32 0.7978846, %v1139_v56 }
 0x160   : > { %3055 = vtanh.f32 %v1210_v29  ;;  %v1364_v5 = vmul.f32 0.5, %v1300_v49  ;;  %v1323_v54 = vadd.f32 1.0, %v4013_v47 }
 0x161   : > { %v1052_v58 = vmul.f32 0.044715, %v988_v7  ;;  %v1706_v46 = vpack.c.bf16 %v1694_v16, %v1693_v40  ;;  %3057 = vtanh.f32 %v1199_v28  ;;  %v955_v7 = vmul.f32 %v4048_v2, %v4048_v2 }
 0x162   : > { %v826_v52 = vpop.f32.mrf.mxu2  ;;  %3059 = vtanh.f32 %v1214_v61  ;;  %v1428_v14 = vmul.f32 %v1364_v5, %v3962_v44  ;;  %v1207_v44 = vmul.f32 0.7978846, %v1143_v11  ;;  %v959_v16 = vmul.f32 %v4052_v45, %v4052_v45 }
 0x163   : > { %v1116_v0 = vadd.f32 %v1052_v58, %v4011_v26  ;;  %v4034_v18 = vadd.f32 %v826_v52, %v3831_v39  ;;  %1798 = vmatmul.bf16.gmra.mxu1 %v1706_v46  ;;  %v1387_v52 = vmul.f32 0.5, %v1323_v54  ;;  %v1019_v5 = vmul.f32 %v955_v7, %v4048_v2 }
 0x164   : > { %v1667_v34 = vpop.f32.mrf.mxu0 }
 0x165   : > { %v3054_v55 = vpop.eup %3053  ;;  %v1180_v28 = vmul.f32 0.7978846, %v1116_v0  ;;  %v928_v43 = vmul.f32 %v4034_v18, %v4034_v18  ;;  %v1668_v15 = vadd.f32 %v3828_v37, %v1667_v34 }
 0x166   : > { %v3056_v50 = vpop.eup %3055  ;;  %v1304_v63 = vadd.f32 1.0, %v3054_v55  ;;  %v4077_v55 = vpop.f32.mrf.mxu3 }
 0x167   : > { %v3058_v24 = vpop.eup %3057  ;;  %3061 = vtanh.f32 %v1180_v28  ;;  %v992_v8 = vmul.f32 %v928_v43, %v4034_v18  ;;  %2048 = vmatmul.bf16.gmra.mxu2 %v1490_v60  ;;  %v1338_v59 = vadd.f32 1.0, %v3056_v50  ;;  %v1695_v9 = vmax.f32 %v1668_v15, 0.0  ;;  %v2848_v28 = vld [vmem:[#allocation11 + $0xd0] sm:$0xff] }
 0x168   : > { %v3060_v29 = vpop.eup %3059  ;;  %2097 = vmatmul.bf16.gmra.mxu3 %v1491_v10  ;;  %v1368_v41 = vmul.f32 0.5, %v1304_v63  ;;  %v1327_v42 = vadd.f32 1.0, %v3058_v24  ;;  %v1023_v43 = vmul.f32 %v959_v16, %v4052_v45  ;;  %v1451_v63 = vmul.f32 %v1387_v52, %v3769_v12  ;;  %2172 = vmatpush.bf16.msra.mxu1 %v2848_v28 }
 0x169   : > { %v1056_v53 = vmul.f32 0.044715, %v992_v8  ;;  %v1342_v61 = vadd.f32 1.0, %v3060_v29  ;;  %v1402_v23 = vmul.f32 0.5, %v1338_v59  ;;  %v1083_v29 = vmul.f32 0.044715, %v1019_v5 }
 0x16a   : > { %v829_v57 = vpop.f32.mrf.mxu2  ;;  %v1432_v60 = vmul.f32 %v1368_v41, %v3987_v38  ;;  %v1391_v3 = vmul.f32 0.5, %v1327_v42 }
 0x16b   : > { %v1120_v21 = vadd.f32 %v1056_v53, %v4034_v18  ;;  %v4060_v1 = vadd.f32 %v829_v57, %v3831_v39  ;;  %v1406_v40 = vmul.f32 0.5, %v1342_v61  ;;  %v4070_v46 = vmul.f32 %v1402_v23, %v3780_v22 }
 0x16c   : > { %v1669_v49 = vpop.f32.mrf.mxu0  ;;  %v1484_v36 = vpack.c.bf16 %v1432_v60, %v1428_v14  ;;  %v1455_v24 = vmul.f32 %v1391_v3, %v3814_v27  ;;  %v1087_v53 = vmul.f32 0.044715, %v1023_v43  ;;  %v1147_v54 = vadd.f32 %v1083_v29, %v4048_v2 }
 0x16d   : > { %v3062_v38 = vpop.eup %3061  ;;  %v1184_v4 = vmul.f32 0.7978846, %v1120_v21  ;;  %v932_v47 = vmul.f32 %v4060_v1, %v4060_v1  ;;  %v1670_v58 = vadd.f32 %v3828_v37, %v1669_v49  ;;  %v4073_v33 = vmul.f32 %v1406_v40, %v3800_v13 }
 0x16e   : > { %2136 = vmatmul.bf16.gmra.mxu0 %v1484_v36  ;;  %v1308_v56 = vadd.f32 1.0, %v3062_v38  ;;  %v1495_v12 = vpack.c.bf16 %v1455_v24, %v1451_v63  ;;  %v1151_v23 = vadd.f32 %v1087_v53, %v4052_v45 }
 0x16f   : > { %v996_v0 = vmul.f32 %v932_v47, %v4060_v1  ;;  %v1696_v34 = vmax.f32 %v1670_v58, 0.0  ;;  %3063 = vtanh.f32 %v1184_v4  ;;  %v1502_v22 = vpack.c.bf16 %v4073_v33, %v4070_v46  ;;  %v3122_v33 = vld [vmem:[%s4443_s2] ss:$0 sm:$0xff] }
 0x170   : > { %3065 = vtanh.f32 %v1203_v6  ;;  %v1372_v14 = vmul.f32 0.5, %v1308_v56  ;;  %v1215_v58 = vmul.f32 0.7978846, %v1151_v23 }
 0x171   : > { %v1060_v50 = vmul.f32 0.044715, %v996_v0  ;;  %v1707_v13 = vpack.c.bf16 %v1696_v34, %v1695_v9  ;;  %3067 = vtanh.f32 %v1207_v44  ;;  %v4097_v44 = vpop.f32.mrf.mxu3  ;;  %v3121_v9 = vld [vmem:[%s4447_s6] sm:$0xf] }
 0x172   : > { %v831_v10 = vpop.f32.mrf.mxu2  ;;  %v1436_v21 = vmul.f32 %v1372_v14, %v4011_v26  ;;  %v4111_v0 = vperm.slane %v3121_v9, 3 }
 0x173   : > { %v1124_v11 = vadd.f32 %v1060_v50, %v4060_v1  ;;  %v4086_v8 = vadd.f32 %v831_v10, %v3831_v39  ;;  %1803 = vmatmul.bf16.gmra.mxu1 %v1707_v13  ;;  %v2847_v13 = vld [vmem:[#allocation11 + $0xc8] sm:$0xff] }
 0x174   : > { %v1672_v41 = vpop.f32.mrf.mxu0  ;;  %v4116_v24 = vadd.f32 %v3980_v20, %v4111_v0  ;;  %2173 = vmatpush.bf16.msra.mxu1 %v2847_v13  ;;  %v4126_v53 = vadd.f32 %v4016_v51, %v4111_v0 }
 0x175   : > { %v3064_v6 = vpop.eup %3063  ;;  %v1188_v59 = vmul.f32 0.7978846, %v1124_v11  ;;  %v936_v61 = vmul.f32 %v4086_v8, %v4086_v8  ;;  %v1673_v30 = vadd.f32 %v3828_v37, %v1672_v41 }
 0x176   : > { %v3066_v15 = vpop.eup %3065  ;;  %v1312_v57 = vadd.f32 1.0, %v3064_v6 }
 0x177   : > { %v3068_v27 = vpop.eup %3067  ;;  %3069 = vtanh.f32 %v1188_v59  ;;  %v1000_v60 = vmul.f32 %v936_v61, %v4086_v8  ;;  %2053 = vmatmul.bf16.gmra.mxu2 %v1494_v31  ;;  %v1331_v49 = vadd.f32 1.0, %v3066_v15  ;;  %v1211_v31 = vmul.f32 0.7978846, %v1147_v54 }
 0x178   : > { %2102 = vmatmul.bf16.gmra.mxu3 %v1495_v12  ;;  %v1376_v42 = vmul.f32 0.5, %v1312_v57  ;;  %v1335_v36 = vadd.f32 1.0, %v3068_v27  ;;  %v1697_v56 = vmax.f32 %v1673_v30, 0.0  ;;  %v901_v57 = vmul.f32 %v4116_v24, %v4116_v24 }
 0x179   : > { %v1064_v40 = vmul.f32 0.044715, %v1000_v60  ;;  %v1395_v34 = vmul.f32 0.5, %v1331_v49  ;;  %v4128_v59 = vpop.f32.mrf.mxu3 }
 0x17a   : > { %v834_v7 = vpop.f32.mrf.mxu2  ;;  %v1440_v16 = vmul.f32 %v1376_v42, %v4034_v18  ;;  %v1399_v5 = vmul.f32 0.5, %v1335_v36  ;;  %v905_v42 = vmul.f32 %v4126_v53, %v4126_v53 }
 0x17b   : > { %v1128_v38 = vadd.f32 %v1064_v40, %v4086_v8  ;;  %v4103_v17 = vadd.f32 %v834_v7, %v3831_v39  ;;  %v1459_v29 = vmul.f32 %v1395_v34, %v3946_v62  ;;  %v965_v7 = vmul.f32 %v901_v57, %v4116_v24 }
 0x17c   : > { %v1674_v4 = vpop.f32.mrf.mxu0  ;;  %v1488_v26 = vpack.c.bf16 %v1440_v16, %v1436_v21  ;;  %v1463_v41 = vmul.f32 %v1399_v5, %v3978_v48 }
 0x17d   : > { %v3070_v47 = vpop.eup %3069  ;;  %v1192_v52 = vmul.f32 0.7978846, %v1128_v38  ;;  %v940_v3 = vmul.f32 %v4103_v17, %v4103_v17  ;;  %v1675_v18 = vadd.f32 %v3828_v37, %v1674_v4 }
 0x17e   : > { %2141 = vmatmul.bf16.gmra.mxu0 %v1488_v26  ;;  %v1316_v50 = vadd.f32 1.0, %v3070_v47  ;;  %v1499_v27 = vpack.c.bf16 %v1463_v41, %v1459_v29 }
 0x17f   : > { %3071 = vtanh.f32 %v1192_v52  ;;  %v1004_v28 = vmul.f32 %v940_v3, %v4103_v17  ;;  %v1698_v43 = vmax.f32 %v1675_v18, 0.0 }
 0x180   : > { %3073 = vtanh.f32 %v1211_v31  ;;  %v1380_v61 = vmul.f32 0.5, %v1316_v50 }
 0x181   : > { %v1068_v10 = vmul.f32 0.044715, %v1004_v28  ;;  %v1708_v63 = vpack.c.bf16 %v1698_v43, %v1697_v56  ;;  %3075 = vtanh.f32 %v1215_v58  ;;  %v1029_v58 = vmul.f32 0.044715, %v965_v7  ;;  %v4152_v52 = vpop.f32.mrf.mxu3  ;;  %v2846_v43 = vld [vmem:[#allocation11 + $0xc0] sm:$0xff] }
 0x182   : > { %v836_v11 = vpop.f32.mrf.mxu2  ;;  %v1444_v23 = vmul.f32 %v1380_v61, %v4060_v1  ;;  %2174 = vmatpush.bf16.msra.mxu1 %v2846_v43 }
 0x183   : > { %v1132_v14 = vadd.f32 %v1068_v10, %v4103_v17  ;;  %v4122_v6 = vadd.f32 %v836_v11, %v3831_v39  ;;  %1808 = vmatmul.bf16.gmra.mxu1 %v1708_v63  ;;  %v4157_v10 = vadd.f32 %v4039_v25, %v4111_v0  ;;  %v1093_v29 = vadd.f32 %v1029_v58, %v4116_v24 }
 0x184   : > { %v1677_v20 = vpop.f32.mrf.mxu0  ;;  %v4169_v25 = vadd.f32 %v4077_v55, %v4111_v0 }
 0x185   : > { %v3072_v15 = vpop.eup %3071  ;;  %v1196_v12 = vmul.f32 0.7978846, %v1132_v14  ;;  %v944_v62 = vmul.f32 %v4122_v6, %v4122_v6  ;;  %v1678_v35 = vadd.f32 %v3828_v37, %v1677_v20 }
 0x186   : > { %v3074_v48 = vpop.eup %3073  ;;  %v1320_v60 = vadd.f32 1.0, %v3072_v15 }
 0x187   : > { %v3076_v54 = vpop.eup %3075  ;;  %3077 = vtanh.f32 %v1196_v12  ;;  %v1008_v51 = vmul.f32 %v944_v62, %v4122_v6  ;;  %2058 = vmatmul.bf16.gmra.mxu2 %v1498_v32  ;;  %v1339_v36 = vadd.f32 1.0, %v3074_v48  ;;  %v969_v32 = vmul.f32 %v905_v42, %v4126_v53 }
 0x188   : > { %2107 = vmatmul.bf16.gmra.mxu3 %v1499_v27  ;;  %v1384_v21 = vmul.f32 0.5, %v1320_v60  ;;  %v1343_v38 = vadd.f32 1.0, %v3076_v54  ;;  %v1699_v9 = vmax.f32 %v1678_v35, 0.0  ;;  %v909_v62 = vmul.f32 %v4157_v10, %v4157_v10 }
 0x189   : > { %v1072_v40 = vmul.f32 0.044715, %v1008_v51  ;;  %v1403_v3 = vmul.f32 0.5, %v1339_v36  ;;  %v1033_v56 = vmul.f32 0.044715, %v969_v32  ;;  %v913_v54 = vmul.f32 %v4169_v25, %v4169_v25  ;;  %v4181_v51 = vpop.f32.mrf.mxu3 }
 0x18a   : > { %v839_v16 = vpop.f32.mrf.mxu2  ;;  %v1448_v49 = vmul.f32 %v1384_v21, %v4086_v8  ;;  %v1407_v18 = vmul.f32 0.5, %v1343_v38  ;;  %v1157_v27 = vmul.f32 0.7978846, %v1093_v29 }
 0x18b   : > { %v1136_v30 = vadd.f32 %v1072_v40, %v4122_v6  ;;  %v4146_v19 = vadd.f32 %v839_v16, %v3831_v39  ;;  %v1467_v63 = vmul.f32 %v1403_v3, %v4048_v2  ;;  %v1097_v20 = vadd.f32 %v1033_v56, %v4126_v53 }
 0x18c   : > { %v1679_v31 = vpop.f32.mrf.mxu0  ;;  %v1492_v4 = vpack.c.bf16 %v1448_v49, %v1444_v23  ;;  %v1471_v11 = vmul.f32 %v1407_v18, %v4052_v45  ;;  %v973_v40 = vmul.f32 %v909_v62, %v4157_v10  ;;  %v4200_v56 = vadd.f32 %v4097_v44, %v4111_v0 }
 0x18d   : > { %v3078_v1 = vpop.eup %3077  ;;  %v1200_v26 = vmul.f32 0.7978846, %v1136_v30  ;;  %v948_v47 = vmul.f32 %v4146_v19, %v4146_v19  ;;  %v1680_v8 = vadd.f32 %v3828_v37, %v1679_v31  ;;  %v1161_v55 = vmul.f32 0.7978846, %v1097_v20 }
 0x18e   : > { %2146 = vmatmul.bf16.gmra.mxu0 %v1492_v4  ;;  %v1324_v28 = vadd.f32 1.0, %v3078_v1  ;;  %v1503_v48 = vpack.c.bf16 %v1471_v11, %v1467_v63  ;;  %v1037_v31 = vmul.f32 0.044715, %v973_v40 }
 0x18f   : > { %3079 = vtanh.f32 %v1200_v26  ;;  %v1012_v34 = vmul.f32 %v948_v47, %v4146_v19  ;;  %v1700_v5 = vmax.f32 %v1680_v8, 0.0 }
 0x190   : > { %v1388_v15 = vmul.f32 0.5, %v1324_v28 }
 0x191   : > { %v1076_v50 = vmul.f32 0.044715, %v1012_v34  ;;  %v1709_v13 = vpack.c.bf16 %v1700_v5, %v1699_v9  ;;  %v1101_v5 = vadd.f32 %v1037_v31, %v4157_v10 }
 0x192   : > { %v841_v37 = vpop.f32.mrf.mxu2  ;;  %v1452_v21 = vmul.f32 %v1388_v15, %v4103_v17  ;;  %v977_v17 = vmul.f32 %v913_v54, %v4169_v25 }
 0x193   : > { %v1140_v41 = vadd.f32 %v1076_v50, %v4146_v19  ;;  %v4164_v14 = vadd.f32 %v841_v37, %v3831_v39  ;;  %1813 = vmatmul.bf16.gmra.mxu1 %v1709_v13  ;;  %v4209_v13 = vadd.f32 %v4128_v59, %v4111_v0 }
 0x194   : > { %v1682_v61 = vpop.f32.mrf.mxu0  ;;  %v1041_v47 = vmul.f32 0.044715, %v977_v17 }
 0x195   : > { %v3080_v2 = vpop.eup %3079  ;;  %v1204_v12 = vmul.f32 0.7978846, %v1140_v41  ;;  %v952_v45 = vmul.f32 %v4164_v14, %v4164_v14  ;;  %v921_v59 = vmul.f32 %v4209_v13, %v4209_v13 }
 0x196   : > { %v1328_v57 = vadd.f32 1.0, %v3080_v2  ;;  %v1105_v50 = vadd.f32 %v1041_v47, %v4169_v25 }
 0x197   : > { %3081 = vtanh.f32 %v1204_v12  ;;  %v1016_v60 = vmul.f32 %v952_v45, %v4164_v14  ;;  %2063 = vmatmul.bf16.gmra.mxu2 %v1502_v22  ;;  %v1683_v22 = vadd.f32 %v3122_v33, %v1682_v61  ;;  %v1165_v61 = vmul.f32 0.7978846, %v1101_v5 }
 0x198   : > { %2112 = vmatmul.bf16.gmra.mxu3 %v1503_v48  ;;  %v1392_v42 = vmul.f32 0.5, %v1328_v57  ;;  %3083 = vtanh.f32 %v1157_v27  ;;  %v1169_v2 = vmul.f32 0.7978846, %v1105_v50  ;;  %v985_v54 = vmul.f32 %v921_v59, %v4209_v13 }
 0x199   : > { %v1080_v23 = vmul.f32 0.044715, %v1016_v60  ;;  %3085 = vtanh.f32 %v1161_v55  ;;  %v1701_v4 = vmax.f32 %v1683_v22, 0.0 }
 0x19a   : > { %v844_v7 = vpop.f32.mrf.mxu2  ;;  %v1456_v16 = vmul.f32 %v1392_v42, %v4122_v6 }
 0x19b   : > { %v1144_v46 = vadd.f32 %v1080_v23, %v4164_v14  ;;  %v4191_v49 = vadd.f32 %v844_v7, %v3831_v39 }
 0x19c   : > { %v1684_v36 = vpop.f32.mrf.mxu0  ;;  %v1496_v38 = vpack.c.bf16 %v1456_v16, %v1452_v21 }
 0x19d   : > { %v3082_v30 = vpop.eup %3081  ;;  %v1208_v35 = vmul.f32 0.7978846, %v1144_v46  ;;  %v956_v6 = vmul.f32 %v4191_v49, %v4191_v49  ;;  %v1685_v32 = vadd.f32 %v3122_v33, %v1684_v36 }
 0x19e   : > { %2151 = vmatmul.bf16.gmra.mxu0 %v1496_v38  ;;  %v1332_v8 = vadd.f32 1.0, %v3082_v30  ;;  %v3084_v58 = vpop.eup %3083  ;;  %v4230_v30 = vadd.f32 %v4152_v52, %v4111_v0 }
 0x19f   : > { %3087 = vtanh.f32 %v1208_v35  ;;  %v1020_v1 = vmul.f32 %v956_v6, %v4191_v49  ;;  %v1702_v26 = vmax.f32 %v1685_v32, 0.0  ;;  %v3086_v9 = vpop.eup %3085  ;;  %v1285_v11 = vadd.f32 1.0, %v3084_v58 }
 0x1a0   : > { %v1396_v37 = vmul.f32 0.5, %v1332_v8  ;;  %v1289_v29 = vadd.f32 1.0, %v3086_v9 }
 0x1a1   : > { %v1084_v3 = vmul.f32 0.044715, %v1020_v1  ;;  %v1710_v18 = vpack.c.bf16 %v1702_v26, %v1701_v4  ;;  %v1349_v62 = vmul.f32 0.5, %v1285_v11  ;;  %v925_v26 = vmul.f32 %v4230_v30, %v4230_v30 }
 0x1a2   : > { %v846_v34 = vpop.f32.mrf.mxu2  ;;  %v1460_v45 = vmul.f32 %v1396_v37, %v4146_v19  ;;  %v1353_v48 = vmul.f32 0.5, %v1289_v29  ;;  %v878_v19 = vpop.f32.mrf.mxu3 }
 0x1a3   : > { %v1148_v28 = vadd.f32 %v1084_v3, %v4191_v49  ;;  %v4204_v43 = vadd.f32 %v846_v34, %v3831_v39  ;;  %1818 = vmatmul.bf16.gmra.mxu1 %v1710_v18  ;;  %v917_v39 = vmul.f32 %v4200_v56, %v4200_v56  ;;  %v1413_v23 = vmul.f32 %v1349_v62, %v4116_v24 }
 0x1a4   : > { %v1417_v40 = vmul.f32 %v1353_v48, %v4126_v53  ;;  %v4235_v53 = vadd.f32 %v4181_v51, %v4111_v0  ;;  %v989_v5 = vmul.f32 %v925_v26, %v4230_v30 }
 0x1a5   : > { %v3088_v63 = vpop.eup %3087  ;;  %v1212_v41 = vmul.f32 0.7978846, %v1148_v28  ;;  %v960_v44 = vmul.f32 %v4204_v43, %v4204_v43  ;;  %v981_v60 = vmul.f32 %v917_v39, %v4200_v56  ;;  %v4253_v39 = vadd.f32 %v878_v19, %v4111_v0 }
 0x1a6   : > { %v1336_v20 = vadd.f32 1.0, %v3088_v63  ;;  %v1477_v17 = vpack.c.bf16 %v1417_v40, %v1413_v23  ;;  %v929_v52 = vmul.f32 %v4235_v53, %v4235_v53  ;;  %v1053_v11 = vmul.f32 0.044715, %v989_v5 }
 0x1a7   : > { %3089 = vtanh.f32 %v1212_v41  ;;  %v1024_v15 = vmul.f32 %v960_v44, %v4204_v43  ;;  %v1045_v16 = vmul.f32 0.044715, %v981_v60 }
 0x1a8   : > { %v1400_v12 = vmul.f32 0.5, %v1336_v20  ;;  %3091 = vtanh.f32 %v1165_v61  ;;  %v993_v28 = vmul.f32 %v929_v52, %v4235_v53  ;;  %v1117_v61 = vadd.f32 %v1053_v11, %v4230_v30 }
 0x1a9   : > { %v1088_v57 = vmul.f32 0.044715, %v1024_v15  ;;  %3093 = vtanh.f32 %v1169_v2  ;;  %v1109_v38 = vadd.f32 %v1045_v16, %v4200_v56 }
 0x1aa   : > { %v1464_v27 = vmul.f32 %v1400_v12, %v4164_v14  ;;  %v1049_v14 = vmul.f32 0.044715, %v985_v54  ;;  %v880_v47 = vpop.f32.mrf.mxu3  ;;  %v1057_v29 = vmul.f32 0.044715, %v993_v28  ;;  %v1181_v59 = vmul.f32 0.7978846, %v1117_v61 }
 0x1ab   : > { %v1152_v55 = vadd.f32 %v1088_v57, %v4204_v43  ;;  %v1173_v1 = vmul.f32 0.7978846, %v1109_v38  ;;  %v933_v12 = vmul.f32 %v4253_v39, %v4253_v39 }
 0x1ac   : > { %v1500_v42 = vpack.c.bf16 %v1464_v27, %v1460_v45  ;;  %v1113_v24 = vadd.f32 %v1049_v14, %v4209_v13  ;;  %v1121_v15 = vadd.f32 %v1057_v29, %v4235_v53 }
 0x1ad   : > { %v3090_v21 = vpop.eup %3089  ;;  %v1216_v7 = vmul.f32 0.7978846, %v1152_v55  ;;  %v997_v60 = vmul.f32 %v933_v12, %v4253_v39 }
 0x1ae   : > { %2156 = vmatmul.bf16.gmra.mxu0 %v1500_v42  ;;  %v1340_v33 = vadd.f32 1.0, %v3090_v21  ;;  %v3092_v22 = vpop.eup %3091  ;;  %v1177_v8 = vmul.f32 0.7978846, %v1113_v24  ;;  %v1185_v45 = vmul.f32 0.7978846, %v1121_v15 }
 0x1af   : > { %3095 = vtanh.f32 %v1216_v7  ;;  %v3094_v36 = vpop.eup %3093  ;;  %v1293_v32 = vadd.f32 1.0, %v3092_v22  ;;  %v1061_v23 = vmul.f32 0.044715, %v997_v60 }
 0x1b0   : > { %v4225_v46 = vpop.f32.mrf.mxu1  ;;  %v1404_v35 = vmul.f32 0.5, %v1340_v33  ;;  %v1297_v31 = vadd.f32 1.0, %v3094_v36  ;;  %3097 = vtanh.f32 %v1173_v1 }
 0x1b1   : > { %v1357_v18 = vmul.f32 0.5, %v1293_v32  ;;  %3099 = vtanh.f32 %v1177_v8  ;;  %v1125_v33 = vadd.f32 %v1061_v23, %v4253_v39 }
 0x1b2   : > { %v1468_v51 = vmul.f32 %v1404_v35, %v4191_v49  ;;  %v1361_v9 = vmul.f32 0.5, %v1297_v31  ;;  %v883_v44 = vpop.f32.mrf.mxu3  ;;  %3101 = vtanh.f32 %v1181_v59 }
 0x1b3   : > { %2175 = vmatmul.bf16.vlgmr.msra.gmra.mxu1 %v1477_v17  ;;  %v1421_v37 = vmul.f32 %v1357_v18, %v4157_v10  ;;  %v4257_v10 = vadd.f32 %v880_v47, %v4111_v0  ;;  %3103 = vtanh.f32 %v1185_v45  ;;  %v4273_v22 = vadd.f32 %v883_v44, %v4111_v0 }
 0x1b4   : > { %v1425_v63 = vmul.f32 %v1361_v9, %v4169_v25  ;;  %v1189_v24 = vmul.f32 0.7978846, %v1125_v33 }
 0x1b5   : > { %v3096_v6 = vpop.eup %3095  ;;  %v937_v62 = vmul.f32 %v4257_v10, %v4257_v10  ;;  %v941_v35 = vmul.f32 %v4273_v22, %v4273_v22 }
 0x1b6   : > { %v1344_v4 = vadd.f32 1.0, %v3096_v6  ;;  %v3098_v49 = vpop.eup %3097  ;;  %v1481_v20 = vpack.c.bf16 %v1425_v63, %v1421_v37  ;;  %3105 = vtanh.f32 %v1189_v24 }
 0x1b7   : > { %v1301_v25 = vadd.f32 1.0, %v3098_v49  ;;  %v1001_v54 = vmul.f32 %v937_v62, %v4257_v10  ;;  %v1005_v26 = vmul.f32 %v941_v35, %v4273_v22 }
 0x1b8   : > { %v4241_v58 = vpop.f32.mrf.mxu1  ;;  %v1408_v3 = vmul.f32 0.5, %v1344_v4 }
 0x1b9   : > { %v1365_v57 = vmul.f32 0.5, %v1301_v25  ;;  %v1065_v40 = vmul.f32 0.044715, %v1001_v54 }
 0x1ba   : > { %v1472_v34 = vmul.f32 %v1408_v3, %v4204_v43  ;;  %v3100_v43 = vpop.eup %3099  ;;  %v885_v55 = vpop.f32.mrf.mxu3  ;;  %v1069_v3 = vmul.f32 0.044715, %v1005_v26 }
 0x1bb   : > { %v1305_v2 = vadd.f32 1.0, %v3100_v43  ;;  %v1429_v42 = vmul.f32 %v1365_v57, %v4200_v56  ;;  %v3102_v7 = vpop.eup %3101  ;;  %v1129_v17 = vadd.f32 %v1065_v40, %v4257_v10  ;;  %v4277_v36 = vadd.f32 %v885_v55, %v4111_v0 }
 0x1bc   : > { %v1504_v50 = vpack.c.bf16 %v1472_v34, %v1468_v51  ;;  %v3104_v14 = vpop.eup %3103 }
 0x1bd   : > { %v1369_v27 = vmul.f32 0.5, %v1305_v2  ;;  %v1313_v38 = vadd.f32 1.0, %v3104_v14  ;;  %v1193_v6 = vmul.f32 0.7978846, %v1129_v17  ;;  %v945_v32 = vmul.f32 %v4277_v36, %v4277_v36  ;;  %v3106_v34 = vpop.eup %3105 }
 0x1be   : > { %2161 = vmatmul.bf16.gmra.mxu0 %v1504_v50  ;;  %v1133_v50 = vadd.f32 %v1069_v3, %v4273_v22 }
 0x1bf   : > { %v1433_v21 = vmul.f32 %v1369_v27, %v4209_v13  ;;  %v1309_v13 = vadd.f32 1.0, %v3102_v7  ;;  %v1377_v1 = vmul.f32 0.5, %v1313_v38  ;;  %3107 = vtanh.f32 %v1193_v6 }
 0x1c0   : > { %v4249_v41 = vpop.f32.mrf.mxu1  ;;  %v1009_v47 = vmul.f32 %v945_v32, %v4277_v36  ;;  %v1197_v29 = vmul.f32 0.7978846, %v1133_v50 }
 0x1c1   : > { %v1485_v16 = vpack.c.bf16 %v1433_v21, %v1429_v42  ;;  %v1373_v4 = vmul.f32 0.5, %v1309_v13  ;;  %v1441_v52 = vmul.f32 %v1377_v1, %v4235_v53  ;;  %v1317_v53 = vadd.f32 1.0, %v3106_v34 }
 0x1c2   : > { %v888_v56 = vpop.f32.mrf.mxu3  ;;  %v1073_v18 = vmul.f32 0.044715, %v1009_v47  ;;  %3109 = vtanh.f32 %v1197_v29 }
 0x1c3   : > { %2180 = vmatmul.bf16.gmra.mxu1 %v1481_v20  ;;  %v1437_v8 = vmul.f32 %v1373_v4, %v4230_v30  ;;  %v4293_v37 = vadd.f32 %v888_v56, %v4111_v0  ;;  %v1381_v15 = vmul.f32 0.5, %v1317_v53 }
 0x1c4   : > { %v1137_v63 = vadd.f32 %v1073_v18, %v4277_v36 }
 0x1c5   : > { %v1489_v5 = vpack.c.bf16 %v1441_v52, %v1437_v8  ;;  %v3108_v28 = vpop.eup %3107  ;;  %v949_v49 = vmul.f32 %v4293_v37, %v4293_v37  ;;  %v1445_v12 = vmul.f32 %v1381_v15, %v4253_v39 }
 0x1c6   : > { %v1321_v11 = vadd.f32 1.0, %v3108_v28  ;;  %v1201_v44 = vmul.f32 0.7978846, %v1137_v63  ;;  %v2029_v28 = vpop.f32.mrf.mxu2 }
 0x1c7   : > { %v1013_v2 = vmul.f32 %v949_v49, %v4293_v37 }
 0x1c8   : > { %v4263_v48 = vpop.f32.mrf.mxu1  ;;  %v1385_v25 = vmul.f32 0.5, %v1321_v11  ;;  %3111 = vtanh.f32 %v1201_v44  ;;  %v3110_v60 = vpop.eup %3109 }
 0x1c9   : > { %v1077_v62 = vmul.f32 0.044715, %v1013_v2  ;;  %v1325_v39 = vadd.f32 1.0, %v3110_v60 }
 0x1ca   : > { %v890_v51 = vpop.f32.mrf.mxu3  ;;  %v1449_v45 = vmul.f32 %v1385_v25, %v4257_v10 }
 0x1cb   : > { %v4297_v30 = vadd.f32 %v890_v51, %v4111_v0  ;;  %v1141_v42 = vadd.f32 %v1077_v62, %v4293_v37  ;;  %v1389_v13 = vmul.f32 0.5, %v1325_v39  ;;  %v2127_v29 = vpop.f32.mrf.mxu0 }
 0x1cc   : > { %v1493_v55 = vpack.c.bf16 %v1449_v45, %v1445_v12 }
 0x1cd   : > { %v953_v20 = vmul.f32 %v4297_v30, %v4297_v30  ;;  %v1205_v10 = vmul.f32 0.7978846, %v1141_v42  ;;  %v1453_v6 = vmul.f32 %v1389_v13, %v4273_v22 }
 0x1ce   : > { %v3112_v54 = vpop.eup %3111  ;;  %v2031_v15 = vpop.f32.mrf.mxu2 }
 0x1cf   : > { %v1017_v59 = vmul.f32 %v953_v20, %v4297_v30  ;;  %3113 = vtanh.f32 %v1205_v10 }
 0x1d0   : > { %v4269_v19 = vpop.f32.mrf.mxu1 }
 0x1d1   : > { %v1081_v57 = vmul.f32 0.044715, %v1017_v59 }
 0x1d2   : > { %v893_v61 = vpop.f32.mrf.mxu3 }
 0x1d3   : > { %2185 = vmatmul.bf16.gmra.mxu1 %v1485_v16  ;;  %v894_v21 = vadd.f32 %v893_v61, %v4111_v0  ;;  %v1145_v40 = vadd.f32 %v1081_v57, %v4297_v30  ;;  %v1329_v16 = vadd.f32 1.0, %v3112_v54  ;;  %v2129_v12 = vpop.f32.mrf.mxu0 }
 0x1d5   : > { %v957_v14 = vmul.f32 %v894_v21, %v894_v21  ;;  %v1209_v33 = vmul.f32 0.7978846, %v1145_v40  ;;  %v1393_v38 = vmul.f32 0.5, %v1329_v16  ;;  %v3114_v26 = vpop.eup %3113  ;;  %v4334_v40 = vld [vmem:[%s4449_s8] ss:$0 sm:$0xff] }
 0x1d6   : > { %v1333_v51 = vadd.f32 1.0, %v3114_v26  ;;  %v2034_v60 = vpop.f32.mrf.mxu2  ;;  %v2030_v10 = vadd.f32 %v4334_v40, %v2029_v28 }
 0x1d7   : > { %v1021_v24 = vmul.f32 %v957_v14, %v894_v21  ;;  %3115 = vtanh.f32 %v1209_v33  ;;  %v1457_v32 = vmul.f32 %v1393_v38, %v4277_v36  ;;  %v2032_v38 = vadd.f32 %v4334_v40, %v2031_v15 }
 0x1d8   : > { %v4283_v31 = vpop.f32.mrf.mxu1  ;;  %v1397_v22 = vmul.f32 0.5, %v1333_v51 }
 0x1d9   : > { %v1085_v4 = vmul.f32 0.044715, %v1021_v24  ;;  %v1497_v47 = vpack.c.bf16 %v1457_v32, %v1453_v6 }
 0x1da   : > { %v895_v23 = vpop.f32.mrf.mxu3  ;;  %v1461_v53 = vmul.f32 %v1397_v22, %v4293_v37 }
 0x1db   : > { %v896_v7 = vadd.f32 %v895_v23, %v4111_v0  ;;  %v1149_v52 = vadd.f32 %v1085_v4, %v894_v21  ;;  %v2132_v23 = vpop.f32.mrf.mxu0 }
 0x1dd   : > { %v961_v17 = vmul.f32 %v896_v7, %v896_v7  ;;  %v3116_v8 = vpop.eup %3115  ;;  %v1213_v34 = vmul.f32 0.7978846, %v1149_v52  ;;  %v2035_v52 = vadd.f32 %v4334_v40, %v2034_v60 }
 0x1de   : > { %v1337_v18 = vadd.f32 1.0, %v3116_v8  ;;  %v2036_v39 = vpop.f32.mrf.mxu2 }
 0x1df   : > { %v1025_v35 = vmul.f32 %v961_v17, %v896_v7  ;;  %3117 = vtanh.f32 %v1213_v34 }
 0x1e0   : > { %v4289_v9 = vpop.f32.mrf.mxu1  ;;  %v1401_v63 = vmul.f32 0.5, %v1337_v18 }
 0x1e1   : > { %v1089_v0 = vmul.f32 0.044715, %v1025_v35  ;;  %v4341_v35 = vld [vmem:[#allocation8] ss:$0 sm:$0xff] }
 0x1e2   : > { %v2078_v36 = vpop.f32.mrf.mxu3  ;;  %v1465_v11 = vmul.f32 %v1401_v63, %v4297_v30 }
 0x1e3   : > { %2190 = vmatmul.bf16.gmra.mxu1 %v1489_v5  ;;  %v1153_v3 = vadd.f32 %v1089_v0, %v896_v7 }
 0x1e4   : > { %v1501_v20 = vpack.c.bf16 %v1465_v11, %v1461_v53 }
 0x1e5   : > { %v1217_v5 = vmul.f32 0.7978846, %v1153_v3  ;;  %v3118_v44 = vpop.eup %3117 }
 0x1e6   : > { %v1341_v25 = vadd.f32 1.0, %v3118_v44  ;;  %v2039_v17 = vpop.f32.mrf.mxu2 }
 0x1e7   : > { %3119 = vtanh.f32 %v1217_v5  ;;  %v2040_v15 = vadd.f32 %v4334_v40, %v2039_v17 }
 0x1e8   : > { %v4303_v43 = vpop.f32.mrf.mxu1  ;;  %v1405_v62 = vmul.f32 0.5, %v1341_v25 }
 0x1ea   : > { %v2080_v59 = vpop.f32.mrf.mxu3  ;;  %v1469_v37 = vmul.f32 %v1405_v62, %v894_v21  ;;  %v2134_v21 = vpop.f32.mrf.mxu0 }
 0x1eb   : > { %v2081_v32 = vadd.f32 %v2080_v59, %v2032_v38 }
 0x1ed   : > { %v3120_v61 = vpop.eup %3119 }
 0x1ee   : > { %v1345_v2 = vadd.f32 1.0, %v3120_v61  ;;  %v2041_v51 = vpop.f32.mrf.mxu2 }
 0x1f0   : > { %v4309_v27 = vpop.f32.mrf.mxu1  ;;  %v1409_v57 = vmul.f32 0.5, %v1345_v2 }
 0x1f2   : > { %v2083_v54 = vpop.f32.mrf.mxu3  ;;  %v2137_v26 = vpop.f32.mrf.mxu0 }
 0x1f3   : > { %2195 = vmatmul.bf16.gmra.mxu1 %v1493_v55  ;;  %v1473_v55 = vmul.f32 %v1409_v57, %v896_v7  ;;  %v2079_v7 = vadd.f32 %v2078_v36, %v2030_v10  ;;  %v2037_v36 = vadd.f32 %v4334_v40, %v2036_v39 }
 0x1f5   : > { %v1505_v42 = vpack.c.bf16 %v1473_v55, %v1469_v37  ;;  %v2128_v33 = vadd.f32 %v2127_v29, %v2079_v7  ;;  %v2042_v55 = vadd.f32 %v4334_v40, %v2041_v51 }
 0x1f6   : > { %v2044_v29 = vpop.f32.mrf.mxu2 }
 0x1f8   : > { %v4315_v56 = vpop.f32.mrf.mxu1 }
 0x1fa   : > { %v2085_v14 = vpop.f32.mrf.mxu3  ;;  %v2139_v22 = vpop.f32.mrf.mxu0 }
 0x1fb   : > { %v2086_v44 = vadd.f32 %v2085_v14, %v2037_v36 }
 0x1fd   : > { %v2135_v61 = vadd.f32 %v2134_v21, %v2086_v44 }
 0x200   : > { %v4319_v1 = vpop.f32.mrf.mxu1 }
 0x202   : > { %v2088_v4 = vpop.f32.mrf.mxu3  ;;  %v2142_v59 = vpop.f32.mrf.mxu0 }
 0x203   : > { %2200 = vmatmul.bf16.gmra.mxu1 %v1497_v47  ;;  %v2130_v47 = vadd.f32 %v2129_v12, %v2081_v32  ;;  %v2089_v62 = vadd.f32 %v2088_v4, %v2040_v15 }
 0x205   : > { %v2138_v60 = vadd.f32 %v2137_v26, %v2089_v62 }
 0x208   : > { %v4321_v50 = vpop.f32.mrf.mxu1 }
 0x20a   : > { %v2090_v5 = vpop.f32.mrf.mxu3  ;;  %v2144_v39 = vpop.f32.mrf.mxu0 }
 0x20b   : > { %v2091_v10 = vadd.f32 %v2090_v5, %v2042_v55 }
 0x20d   : > { %v2140_v21 = vadd.f32 %v2139_v22, %v2091_v10 }
 0x210   : > { %v4325_v49 = vpop.f32.mrf.mxu1 }
 0x212   : > { %v2093_v25 = vpop.f32.mrf.mxu3 }
 0x213   : > { %2205 = vmatmul.bf16.gmra.mxu1 %v1501_v20 }
 0x218   : > { %v4327_v45 = vpop.f32.mrf.mxu1 }
 0x220   : > { %v4329_v30 = vpop.f32.mrf.mxu1 }
 0x223   : > { %2210 = vmatmul.bf16.gmra.mxu1 %v1505_v42  ;;  %v2095_v42 = vpop.f32.mrf.mxu3 }
 0x228   : > { %v4336_v16 = vpop.f32.mrf.mxu1 }
 0x230   : > { %v2176_v13 = vpop.f32.mrf.mxu1 }
 0x231   : > { %v2177_v24 = vadd.f32 %v2176_v13, %v2128_v33  ;;  %v2045_v33 = vadd.f32 %v4334_v40, %v2044_v29 }
 0x233   : > { %v2216_v6 = vadd.f32 %v2177_v24, %v4225_v46  ;;  %v2084_v46 = vadd.f32 %v2083_v54, %v2035_v52  ;;  %v2094_v38 = vadd.f32 %v2093_v25, %v2045_v33  ;;  %v2098_v24 = vpop.f32.mrf.mxu3 }
 0x235   : > { %v2236_v0 = vadd.f32 %v4341_v35, %v2216_v6  ;;  %v2133_v28 = vadd.f32 %v2132_v23, %v2084_v46  ;;  %v2143_v32 = vadd.f32 %v2142_v59, %v2094_v38 }
 0x237   : > { %2252 = vst [vmem:[%s4345_s3] sm:$0xff] %v2236_v0 }
 0x238   : > { %v2178_v8 = vpop.f32.mrf.mxu1 }
 0x239   : > { %v2179_v3 = vadd.f32 %v2178_v8, %v2130_v47 }
 0x23b   : > { %v2217_v18 = vadd.f32 %v2179_v3, %v4241_v58 }
 0x23d   : > { %v2237_v34 = vadd.f32 %v4341_v35, %v2217_v18 }
 0x23f   : > { %2253 = vst [vmem:[%s4345_s3 + $0x8] sm:$0xff] %v2237_v34 }
 0x240   : > { %v2181_v63 = vpop.f32.mrf.mxu1 }
 0x241   : > { %v2182_v53 = vadd.f32 %v2181_v63, %v2133_v28 }
 0x243   : > { %v2218_v11 = vadd.f32 %v2182_v53, %v4249_v41  ;;  %v2046_v41 = vpop.f32.mrf.mxu2 }
 0x244   : > { %v2047_v0 = vadd.f32 %v4334_v40, %v2046_v41 }
 0x245   : > { %v2238_v20 = vadd.f32 %v4341_v35, %v2218_v11 }
 0x246   : > { %v2096_v52 = vadd.f32 %v2095_v42, %v2047_v0 }
 0x247   : > { %2254 = vst [vmem:[%s4345_s3 + $0x10] sm:$0xff] %v2238_v20 }
 0x248   : > { %v2183_v58 = vpop.f32.mrf.mxu1  ;;  %v2145_v51 = vadd.f32 %v2144_v39, %v2096_v52 }
 0x249   : > { %v2184_v2 = vadd.f32 %v2183_v58, %v2135_v61 }
 0x24b   : > { %v2219_v12 = vadd.f32 %v2184_v2, %v4263_v48  ;;  %v2049_v48 = vpop.f32.mrf.mxu2 }
 0x24c   : > { %v2050_v34 = vadd.f32 %v4334_v40, %v2049_v48 }
 0x24d   : > { %v2239_v57 = vadd.f32 %v4341_v35, %v2219_v12 }
 0x24e   : > { %v2099_v63 = vadd.f32 %v2098_v24, %v2050_v34 }
 0x24f   : > { %2255 = vst [vmem:[%s4345_s3 + $0x18] sm:$0xff] %v2239_v57 }
 0x250   : > { %v2186_v37 = vpop.f32.mrf.mxu1 }
 0x251   : > { %v2187_v54 = vadd.f32 %v2186_v37, %v2138_v60 }
 0x253   : > { %v2220_v23 = vadd.f32 %v2187_v54, %v4269_v19  ;;  %v2147_v19 = vpop.f32.mrf.mxu0  ;;  %v2051_v47 = vpop.f32.mrf.mxu2 }
 0x254   : > { %v2148_v53 = vadd.f32 %v2147_v19, %v2099_v63  ;;  %v2052_v11 = vadd.f32 %v4334_v40, %v2051_v47 }
 0x255   : > { %v2240_v14 = vadd.f32 %v4341_v35, %v2220_v23 }
 0x257   : > { %2256 = vst [vmem:[%s4345_s3 + $0x20] sm:$0xff] %v2240_v14 }
 0x258   : > { %v2188_v7 = vpop.f32.mrf.mxu1 }
 0x259   : > { %v2189_v17 = vadd.f32 %v2188_v7, %v2140_v21 }
 0x25b   : > { %v2221_v13 = vadd.f32 %v2189_v17, %v4283_v31  ;;  %v2100_v31 = vpop.f32.mrf.mxu3  ;;  %v2149_v18 = vpop.f32.mrf.mxu0 }
 0x25c   : > { %v2054_v22 = vpop.f32.mrf.mxu2  ;;  %v2101_v58 = vadd.f32 %v2100_v31, %v2052_v11 }
 0x25d   : > { %v2241_v6 = vadd.f32 %v4341_v35, %v2221_v13  ;;  %v2055_v59 = vadd.f32 %v4334_v40, %v2054_v22 }
 0x25e   : > { %v2150_v25 = vadd.f32 %v2149_v18, %v2101_v58 }
 0x25f   : > { %2257 = vst [vmem:[%s4345_s3 + $0x28] sm:$0xff] %v2241_v6 }
 0x260   : > { %v2191_v4 = vpop.f32.mrf.mxu1 }
 0x261   : > { %v2192_v26 = vadd.f32 %v2191_v4, %v2143_v32 }
 0x263   : > { %v2222_v8 = vadd.f32 %v2192_v26, %v4289_v9  ;;  %v2103_v29 = vpop.f32.mrf.mxu3  ;;  %v2152_v20 = vpop.f32.mrf.mxu0 }
 0x264   : > { %v2104_v60 = vadd.f32 %v2103_v29, %v2055_v59 }
 0x265   : > { %v2242_v3 = vadd.f32 %v4341_v35, %v2222_v8 }
 0x266   : > { %v2153_v55 = vadd.f32 %v2152_v20, %v2104_v60 }
 0x267   : > { %2258 = vst [vmem:[%s4345_s3 + $0x30] sm:$0xff] %v2242_v3 }
 0x268   : > { %v2193_v46 = vpop.f32.mrf.mxu1 }
 0x269   : > { %v2194_v5 = vadd.f32 %v2193_v46, %v2145_v51 }
 0x26b   : > { %v2223_v28 = vadd.f32 %v2194_v5, %v4303_v43  ;;  %v2056_v43 = vpop.f32.mrf.mxu2  ;;  %v2105_v62 = vpop.f32.mrf.mxu3 }
 0x26c   : > { %v2154_v41 = vpop.f32.mrf.mxu0  ;;  %v2057_v42 = vadd.f32 %v4334_v40, %v2056_v43 }
 0x26d   : > { %v2243_v36 = vadd.f32 %v4341_v35, %v2223_v28 }
 0x26e   : > { %v2106_v10 = vadd.f32 %v2105_v62, %v2057_v42 }
 0x26f   : > { %2259 = vst [vmem:[%s4345_s3 + $0x38] sm:$0xff] %v2243_v36 }
 0x270   : > { %v2196_v9 = vpop.f32.mrf.mxu1  ;;  %v2155_v48 = vadd.f32 %v2154_v41, %v2106_v10 }
 0x271   : > { %v2197_v44 = vadd.f32 %v2196_v9, %v2148_v53 }
 0x273   : > { %v2224_v61 = vadd.f32 %v2197_v44, %v4309_v27  ;;  %v2059_v27 = vpop.f32.mrf.mxu2  ;;  %v2108_v14 = vpop.f32.mrf.mxu3 }
 0x274   : > { %v2060_v33 = vadd.f32 %v4334_v40, %v2059_v27 }
 0x275   : > { %v2244_v15 = vadd.f32 %v4341_v35, %v2224_v61 }
 0x276   : > { %v2109_v24 = vadd.f32 %v2108_v14, %v2060_v33 }
 0x277   : > { %2260 = vst [vmem:[%s4345_s3 + $0x40] sm:$0xff] %v2244_v15 }
 0x278   : > { %v2198_v2 = vpop.f32.mrf.mxu1 }
 0x279   : > { %v2199_v12 = vadd.f32 %v2198_v2, %v2150_v25 }
 0x27b   : > { %v2225_v57 = vadd.f32 %v2199_v12, %v4315_v56  ;;  %v2157_v56 = vpop.f32.mrf.mxu0  ;;  %v2061_v13 = vpop.f32.mrf.mxu2 }
 0x27c   : > { %v2158_v19 = vadd.f32 %v2157_v56, %v2109_v24  ;;  %v2062_v0 = vadd.f32 %v4334_v40, %v2061_v13 }
 0x27d   : > { %v2245_v37 = vadd.f32 %v4341_v35, %v2225_v57 }
 0x27f   : > { %2261 = vst [vmem:[%s4345_s3 + $0x48] sm:$0xff] %v2245_v37 }
 0x280   : > { %v2201_v54 = vpop.f32.mrf.mxu1 }
 0x281   : > { %v2202_v23 = vadd.f32 %v2201_v54, %v2153_v55 }
 0x283   : > { %v2226_v39 = vadd.f32 %v2202_v23, %v4319_v1  ;;  %v2110_v1 = vpop.f32.mrf.mxu3  ;;  %v2159_v32 = vpop.f32.mrf.mxu0 }
 0x284   : > { %v2064_v8 = vpop.f32.mrf.mxu2  ;;  %v2111_v52 = vadd.f32 %v2110_v1, %v2062_v0 }
 0x285   : > { %v2246_v21 = vadd.f32 %v4341_v35, %v2226_v39  ;;  %v2065_v51 = vadd.f32 %v4334_v40, %v2064_v8 }
 0x286   : > { %v2160_v31 = vadd.f32 %v2159_v32, %v2111_v52 }
 0x287   : > { %2262 = vst [vmem:[%s4345_s3 + $0x50] sm:$0xff] %v2246_v21 }
 0x288   : > { %v2203_v7 = vpop.f32.mrf.mxu1 }
 0x289   : > { %v2204_v17 = vadd.f32 %v2203_v7, %v2155_v48 }
 0x28b   : > { %v2227_v38 = vadd.f32 %v2204_v17, %v4321_v50  ;;  %v2113_v46 = vpop.f32.mrf.mxu3  ;;  %v2162_v34 = vpop.f32.mrf.mxu0 }
 0x28c   : > { %v2114_v28 = vadd.f32 %v2113_v46, %v2065_v51  ;;  %v2066_v22 = vpop.f32.mrf.mxu2 }
 0x28d   : > { %v2247_v6 = vadd.f32 %v4341_v35, %v2227_v38  ;;  %v2067_v53 = vadd.f32 %v4334_v40, %v2066_v22 }
 0x28e   : > { %v2163_v63 = vadd.f32 %v2162_v34, %v2114_v28 }
 0x28f   : > { %2263 = vst [vmem:[%s4345_s3 + $0x58] sm:$0xff] %v2247_v6 }
 0x290   : > { %v2206_v4 = vpop.f32.mrf.mxu1 }
 0x291   : > { %v2207_v26 = vadd.f32 %v2206_v4, %v2158_v19 }
 0x293   : > { %v2228_v47 = vadd.f32 %v2207_v26, %v4325_v49  ;;  %v2115_v29 = vpop.f32.mrf.mxu3  ;;  %v2164_v44 = vpop.f32.mrf.mxu0 }
 0x295   : > { %v2248_v3 = vadd.f32 %v4341_v35, %v2228_v47 }
 0x297   : > { %2264 = vst [vmem:[%s4345_s3 + $0x60] sm:$0xff] %v2248_v3 }
 0x298   : > { %v2208_v50 = vpop.f32.mrf.mxu1 }
 0x299   : > { %v2209_v18 = vadd.f32 %v2208_v50, %v2160_v31 }
 0x29b   : > { %v2229_v5 = vadd.f32 %v2209_v18, %v4327_v45  ;;  %v2116_v45 = vadd.f32 %v2115_v29, %v2067_v53 }
 0x29d   : > { %v2249_v49 = vadd.f32 %v4341_v35, %v2229_v5  ;;  %v2165_v61 = vadd.f32 %v2164_v44, %v2116_v45 }
 0x29f   : > { %2265 = vst [vmem:[%s4345_s3 + $0x68] sm:$0xff] %v2249_v49 }
 0x2a0   : > { %v2211_v36 = vpop.f32.mrf.mxu1 }
 0x2a1   : > { %v2212_v9 = vadd.f32 %v2211_v36, %v2163_v63 }
 0x2a3   : > { %v2230_v11 = vadd.f32 %v2212_v9, %v4329_v30 }
 0x2a5   : > { %v2250_v20 = vadd.f32 %v4341_v35, %v2230_v11 }
 0x2a7   : > { %2266 = vst [vmem:[%s4345_s3 + $0x70] sm:$0xff] %v2250_v20 }
 0x2a8   : > { %v2213_v58 = vpop.f32.mrf.mxu1 }
 0x2a9   : > { %v2214_v40 = vadd.f32 %v2213_v58, %v2165_v61 }
 0x2ab   : > { %v2231_v30 = vadd.f32 %v2214_v40, %v4336_v16 }
 0x2ad   : > { %v2251_v15 = vadd.f32 %v4341_v35, %v2231_v30 }
 0x2af   : > { %2267 = vst [vmem:[%s4345_s3 + $0x78] sm:$0xff] %v2251_v15 }
 0x2b0   : > { %3330 = shalt.err (!%p3327_p9)
}
 0x2b1   : > { %s3392_s14 = smov 128   ;;  %s3393_s3 = smov 8  }
 0x2b2   : > { %2909 = dma.vmem_to_hbm [thread:$0]  (%p3539_p13), %s2282_s13, 2048, %s2284_s23, %s2269_s16, %s3392_s14, %s3392_s14, %s3393_s3  }
 0x2b3 PF: > { %s2298_s4 = sand.u32 1, %s3369_s30   ;;  %p4467_p10 = scmp.ge.s32.totalorder %s3381_s12, 2 }
 0x2b4   : > { %s2299_s26 = scalar_lea.sflag [#allocation4], %s2298_s4 }
 0x2b5   : > { %p2932_p11 = pnand %p4467_p10, %p3544_p4 }
 0x2b7   : > { %p2933_p0 = pneg %p2932_p11 }
 0x2b9   : > { %3364 = dma.done.wait (%p2933_p0), %s2299_s26, 2048  }
 0x2ba   : > { %3366 = vsyncadd (%p2933_p0), %s2299_s26, 4294965248  ;;  %p25_p2 = scmp.ge.s32.totalorder %s3519_s24, 4   ;;  %s4468_s30 = smov %s3373_s10 }
 0x2bb   : > { %s4469_s10 = smov %s3377_s11  ;;  %s4470_s11 = smov %s3531_s19 }
 0x2bc   : > { %s4471_s12 = smov %s3519_s24  ;;  %27 = sbr.rel (!%p25_p2) target bundleno = 12 (0xc), region = 121 }
 0x2c1   :  { %2305 = vsyncpa [#allocation3], 1 }
 0x2c2   :  { %2307 = vsyncpa [#allocation3 + $0x1], 1 }
 0x2c3   :  { %2308 = vsyncpa [#allocation6], 1 }
 0x2c4   :  { %2309 = vsyncpa [#allocation9], 1 }
 0x2c5   :  { %2310 = vsyncpa [#allocation12], 1 }
 0x2c6   :  { %2311 = vsyncpa [#allocation4], 1 }
 0x2c7   :  { %2313 = vsyncpa [#allocation4 + $0x1], 1 }

</bundles_post_ra>
